<compile_context>
chip_gen: v6e
topology: v6e:2x2x1
jax: 0.10.0
libtpu: 0.0.40
codegen_flags: <defaults>
</compile_context>

<pallas_src>
import functools

import jax
import jax.numpy as jnp
from jax.experimental import pallas as pl
from jax.experimental.pallas import tpu as pltpu


def _round_up(x, m):
    return (x + m - 1) // m * m


# ------------------------------- kernel -------------------------------------

def _decoder_kernel(x_ref, w1_ref, w2_ref, w3_ref, w4_ref, mask_ref, o_ref,
                    rhs_ref, *, padded_w):
    """Fused 4-layer Decoder forward for one lane-group of images.

    x_ref   : (C0p, LG)   f32  zero-padded input images, lane-stacked
    w*_ref  : (Coutp, Kp) bf16 im2col-packed conv(+BN) weights; bias folded into
                               column 9*Cinp (matched by a constant-ones RHS row)
    mask_ref: (1, LG)     f32  1.0 at interior pixels, 0.0 on pad ring/lane tail
    o_ref   : (C4p, LG)   f32  sigmoid output (padding cropped by the wrapper)
    rhs_ref : (Kmax, LG)  f32  scratch holding the stacked im2col RHS
    """
    lg = x_ref.shape[-1]
    mask = mask_ref[...]
    offsets = tuple(dy * padded_w + dx for dy in (-1, 0, 1) for dx in (-1, 0, 1))

    def conv3x3(x, w_ref):
        cinp = x.shape[0]
        kp = w_ref.shape[1]
        extra = kp - 9 * cinp                      # ones row + zero K-padding
        assert extra >= 1 and extra % 8 == 0, (cinp, kp)
        # im2col on the fly: each tap is a static lane roll (XLU slot) of the
        # flattened padded image; all 9 taps are stacked along the contraction
        # (sublane) axis so the whole layer is ONE (Coutp,Kp)x(Kp,LG) MXU matmul.
        for tap, off in enumerate(offsets):
            xs = x if off == 0 else pltpu.roll(x, shift=(-off) % lg, axis=1)
            rhs_ref[pl.ds(tap * cinp, cinp), :] = xs
        # Row 9*cinp is all-ones (carries the bias through the MXU); the rest
        # of the extra block is zero K-padding.
        rhs_ref[pl.ds(9 * cinp, extra), :] = (
            jax.lax.broadcasted_iota(jnp.int32, (extra, lg), 0) == 0
        ).astype(jnp.float32)
        rhs = rhs_ref[pl.ds(0, kp), :].astype(jnp.bfloat16)
        return jnp.dot(w_ref[...], rhs, preferred_element_type=jnp.float32)

    # The `* mask` after each ReLU layer restores the zero pad ring (and zeroes
    # the lane tail) that the next layer's rolled taps rely on for SAME padding.
    x = x_ref[...]
    x = jnp.maximum(conv3x3(x, w1_ref), 0.0) * mask      # Conv2 + Bn2 + ReLU
    x = jnp.maximum(conv3x3(x, w2_ref), 0.0) * mask      # Conv3 + Bn3 + ReLU
    x = jnp.maximum(conv3x3(x, w3_ref), 0.0) * mask      # Conv4 + Bn4 + ReLU
    # Final layer: no mask (wrapper crops pad ring / padded channels).
    o_ref[...] = jax.nn.sigmoid(conv3x3(x, w4_ref))      # Conv5 + Sigmoid


# ------------------------------- wrapper ------------------------------------

def _images_per_group(n):
    """Lane-stack the whole batch on single-TensorCore chips (v5e/v6e); keep a
    2-way core-parallel grid split on multi-core chips (v7x/v4/v5p/unknown)."""
    try:
        kind = jax.devices()[0].device_kind.lower()
    except Exception:
        kind = ""
    single_tc = any(t in kind for t in ("v5e", "v5 lite", "v6e", "v6 lite", "lite"))
    ipg = n if single_tc else max(1, (n + 1) // 2)
    if n % ipg != 0:
        ipg = 1
    return ipg


def decoder_forward(x_nchw, kernel_params):
    """x in NCHW (PyTorch convention); returns NCHW in [0, 1]."""
    w1, w2, w3, w4 = kernel_params
    n, cin, ih, iw = x_nchw.shape
    hp, wp = ih + 2, iw + 2
    l = hp * wp
    lp = _round_up(l, 128)          # lane extent of one zero-padded image
    c0p = _round_up(cin, 8)         # padded Cin of layer 1
    c4p = w4.shape[0]               # padded Cout of layer 4
    kmax = max(int(w.shape[1]) for w in kernel_params)

    ipg = _images_per_group(n)      # images lane-stacked per grid step
    g = n // ipg
    lg = ipg * lp

    # Roll-safety invariant: interior flat indices lie in [wp+1, l-wp-2] and the
    # largest tap offset is wp+1, so interior taps never read the lane tail,
    # never wrap around, and never cross into a neighbouring image's lane block.
    max_off = wp + 1
    assert (l - wp - 2) + max_off < lp and (wp + 1) - max_off >= 0

    # Channel-major layout: pad channels to a sublane multiple, add the 1-pixel
    # zero ring, flatten (Hp, Wp) onto lanes, pad to a 128 multiple, and
    # lane-stack `ipg` images per grid step.  (These pads/reshapes are the only
    # wrapper-side XLA ops; they are mandated by the NCHW in/out contract.)
    xp = jnp.pad(x_nchw, ((0, 0), (0, c0p - cin), (1, 1), (1, 1)))
    xp = jnp.pad(xp.reshape(n, c0p, l), ((0, 0), (0, 0), (0, lp - l)))
    xp = xp.reshape(g, ipg, c0p, lp).transpose(0, 2, 1, 3).reshape(g, c0p, lg)

    # Interior-pixel mask (compile-time constant; XLA folds it to a literal).
    mask = jnp.pad(jnp.ones((ih, iw), jnp.float32), ((1, 1), (1, 1)))
    mask = jnp.pad(mask.reshape(1, l), ((0, 0), (0, lp - l)))
    mask = jnp.tile(mask, (1, ipg))

    kernel = functools.partial(_decoder_kernel, padded_w=wp)

    def _full(a):
        nd = a.ndim
        return pl.BlockSpec(a.shape, lambda i, _nd=nd: (0,) * _nd)

    flops = 2 * sum(int(w.shape[0]) * int(w.shape[1]) for w in kernel_params) * lg * g
    cost = pl.CostEstimate(
        flops=flops,
        transcendentals=int(c4p) * lg * g,
        bytes_accessed=(int(xp.size) * 4 + int(mask.size) * 4
                        + sum(int(w.size) * 2 for w in kernel_params)
                        + g * int(c4p) * lg * 4))

    out = pl.pallas_call(
        kernel,
        out_shape=jax.ShapeDtypeStruct((g, c4p, lg), jnp.float32),
        grid=(g,),
        in_specs=[
            pl.BlockSpec((None, c0p, lg), lambda i: (i, 0, 0)),
            _full(w1), _full(w2), _full(w3), _full(w4),
            _full(mask),
        ],
        out_specs=pl.BlockSpec((None, c4p, lg), lambda i: (i, 0, 0)),
        scratch_shapes=[pltpu.VMEM((kmax, lg), jnp.float32)],
        compiler_params=pltpu.CompilerParams(
            dimension_semantics=("parallel",)),
        cost_estimate=cost,
    )(xp, w1, w2, w3, w4, mask)

    # Un-stack lanes, drop padded channels / pad ring / lane tail -> NCHW.
    out = out.reshape(g, c4p, ipg, lp).transpose(0, 2, 1, 3).reshape(n, c4p, lp)
    out = out[:, :3, :l].reshape(n, 3, hp, wp)[:, :, 1:1 + ih, 1:1 + iw]
    return out


# ----------------------------- parameters ----------------------------------

def _init_conv(key, cin, cout):
    """PyTorch Conv2d default init: U(-1/sqrt(fan_in), 1/sqrt(fan_in))."""
    kw, kb = jax.random.split(key)
    bound = 1.0 / float(cin * 9) ** 0.5
    w = jax.random.uniform(kw, (3, 3, cin, cout), jnp.float32, -bound, bound)
    b = jax.random.uniform(kb, (cout,), jnp.float32, -bound, bound)
    return w, b


def _fold_bn(w_hwio, conv_b, eps=1e-5):
    """Eval-mode BatchNorm2d at torch init folded into the conv weight/bias."""
    cout = w_hwio.shape[-1]
    gamma = jnp.ones((cout,), jnp.float32)
    beta = jnp.zeros((cout,), jnp.float32)
    mean = jnp.zeros((cout,), jnp.float32)
    var = jnp.ones((cout,), jnp.float32)
    scale = gamma * jax.lax.rsqrt(var + eps)
    return w_hwio * scale, (conv_b - mean) * scale + beta


def _pack(w_hwio, b, cin_pad, cout_pad):
    """(3,3,Cin,Cout) HWIO -> (Cout_pad, Kp) bf16 im2col weight, bias folded.

    RHS row layout expected by the kernel: row tap*cin_pad + c holds the
    tap-rolled activation of padded input channel c (tap = (dy+1)*3+(dx+1));
    row 9*cin_pad is a constant-ones row carrying the bias; remaining rows are
    zero K-padding up to Kp = round_up(9*cin_pad + 1, 16).
    """
    _, _, cin, cout = w_hwio.shape
    kp = _round_up(9 * cin_pad + 1, 16)
    wt = jnp.pad(w_hwio.reshape(9, cin, cout),
                 ((0, 0), (0, cin_pad - cin), (0, cout_pad - cout)))
    wk = jnp.zeros((kp, cout_pad), jnp.float32)
    wk = wk.at[:9 * cin_pad].set(wt.reshape(9 * cin_pad, cout_pad))
    wk = wk.at[9 * cin_pad].set(jnp.pad(b, (0, cout_pad - cout)))
    return jnp.transpose(wk).astype(jnp.bfloat16)       # (Cout_pad, Kp)


def decoder_init(key):
    """Conv2->Bn2->ReLU->Conv3->Bn3->ReLU->Conv4->Bn4->ReLU->Conv5->Sigmoid."""
    keys = jax.random.split(key, 4)
    channels = [(3, 8), (8, 16), (16, 8), (8, 3)]
    kernel_params, ref_params = [], []
    for i, (cin, cout) in enumerate(channels):
        w, b = _init_conv(keys[i], cin, cout)
        if i < 3:                       # conv followed by BN (eval) + ReLU
            w, b = _fold_bn(w, b)
        ref_params.append((w, b))
        kernel_params.append(_pack(w, b, _round_up(cin, 8), _round_up(cout, 8)))
    return tuple(kernel_params), tuple(ref_params)


# --------------------------- reference (pure JAX) ---------------------------

def decoder_reference(x_nchw, ref_params):
    acts = ("relu", "relu", "relu", "sigmoid")
    y = x_nchw
    for (w_hwio, b), act in zip(ref_params, acts):
        y = jax.lax.conv_general_dilated(
            y, w_hwio, window_strides=(1, 1), padding="SAME",
            dimension_numbers=("NCHW", "HWIO", "NCHW"),
            precision=jax.lax.Precision.HIGHEST)
        y = y + b.reshape(1, -1, 1, 1)
        y = jnp.maximum(y, 0.0) if act == "relu" else jax.nn.sigmoid(y)
    return y


@jax.jit
def decoder_forward_nchw(x_nchw, kernel_params):
    return decoder_forward(x_nchw, kernel_params)


if __name__ == "__main__":
    key = jax.random.PRNGKey(0)
    k_x, k_params = jax.random.split(key)

    # Small deterministic input consistent with the module: NCHW, 3 channels.
    x = jax.random.uniform(k_x, (2, 3, 16, 16), jnp.float32)

    kernel_params, ref_params = decoder_init(k_params)

    out = decoder_forward_nchw(x, kernel_params)
    out = jax.block_until_ready(out)

    assert out.shape == (2, 3, 16, 16), out.shape
    assert bool(jnp.all(jnp.isfinite(out)))
    assert bool(jnp.all((out >= 0.0) & (out <= 1.0)))   # sigmoid output range

    # Tolerance check against a pure-JAX reference of the same folded params
    # (bf16 MXU operands => not bit-exact, but well within 2e-2).
    ref = decoder_reference(x, ref_params)
    assert bool(jnp.allclose(out, ref, atol=2e-2, rtol=0.0)), (
        float(jnp.max(jnp.abs(out - ref))))

    print("KERNEL_OK")
</pallas_src>

<mosaic_0001>
module attributes {stable_mosaic.version = 11 : i64} {
  func.func @_decoder_kernel(%arg0: i32, %arg1: memref<1x8x384xf32, #tpu.memory_space<vmem>>, %arg2: memref<8x80xbf16, #tpu.memory_space<vmem>>, %arg3: memref<16x80xbf16, #tpu.memory_space<vmem>>, %arg4: memref<8x160xbf16, #tpu.memory_space<vmem>>, %arg5: memref<8x80xbf16, #tpu.memory_space<vmem>>, %arg6: memref<1x384xf32, #tpu.memory_space<vmem>>, %arg7: memref<1x8x384xf32, #tpu.memory_space<vmem>>, %arg8: memref<160x384xf32, #tpu.memory_space<vmem>>) attributes {dimension_semantics = [#tpu.dimension_semantics<parallel>], iteration_bounds = array<i64: 2>, scalar_prefetch = 0 : i64, scratch_operands = 1 : i64, tpu.core_type = #tpu.core_type<tc>, window_params = [{transform_indices = @transform_0, window_bounds = array<i64: 1, 8, 384>}, {pipeline_mode = #tpu.pipeline_mode<synchronous>, transform_indices = @transform_1, window_bounds = array<i64: 8, 80>}, {pipeline_mode = #tpu.pipeline_mode<synchronous>, transform_indices = @transform_2, window_bounds = array<i64: 16, 80>}, {pipeline_mode = #tpu.pipeline_mode<synchronous>, transform_indices = @transform_3, window_bounds = array<i64: 8, 160>}, {pipeline_mode = #tpu.pipeline_mode<synchronous>, transform_indices = @transform_4, window_bounds = array<i64: 8, 80>}, {pipeline_mode = #tpu.pipeline_mode<synchronous>, transform_indices = @transform_5, window_bounds = array<i64: 1, 384>}, {transform_indices = @transform_6, window_bounds = array<i64: 1, 8, 384>}]} {
    %c0 = arith.constant 0 : index
    %c0_0 = arith.constant 0 : index
    %0 = vector.load %arg6[%c0, %c0_0] : memref<1x384xf32, #tpu.memory_space<vmem>>, vector<1x384xf32>
    %c0_1 = arith.constant 0 : index
    %c0_2 = arith.constant 0 : index
    %c0_3 = arith.constant 0 : index
    %1 = vector.load %arg1[%c0_1, %c0_2, %c0_3] : memref<1x8x384xf32, #tpu.memory_space<vmem>>, vector<1x8x384xf32>
    %2 = vector.shape_cast %1 : vector<1x8x384xf32> to vector<8x384xf32>
    %c19_i32 = arith.constant 19 : i32
    %3 = tpu.dynamic_rotate %2 by %c19_i32 dim 1 : vector<8x384xf32>, i32 -> vector<8x384xf32>
    %c0_4 = arith.constant 0 : index
    %c0_5 = arith.constant 0 : index
    %4 = vector.load %arg8[%c0_4, %c0_5] : memref<160x384xf32, #tpu.memory_space<vmem>>, vector<8x384xf32>
    tpu.vector_store %arg8[%c0_4, %c0_5], %3 {strides = array<i32>} : memref<160x384xf32, #tpu.memory_space<vmem>>, vector<8x384xf32>,
    %c18_i32 = arith.constant 18 : i32
    %5 = tpu.dynamic_rotate %2 by %c18_i32 dim 1 : vector<8x384xf32>, i32 -> vector<8x384xf32>
    %c8 = arith.constant 8 : index
    %c0_6 = arith.constant 0 : index
    %6 = vector.load %arg8[%c8, %c0_6] : memref<160x384xf32, #tpu.memory_space<vmem>>, vector<8x384xf32>
    tpu.vector_store %arg8[%c8, %c0_6], %5 {strides = array<i32>} : memref<160x384xf32, #tpu.memory_space<vmem>>, vector<8x384xf32>,
    %c17_i32 = arith.constant 17 : i32
    %7 = tpu.dynamic_rotate %2 by %c17_i32 dim 1 : vector<8x384xf32>, i32 -> vector<8x384xf32>
    %c16 = arith.constant 16 : index
    %c0_7 = arith.constant 0 : index
    %8 = vector.load %arg8[%c16, %c0_7] : memref<160x384xf32, #tpu.memory_space<vmem>>, vector<8x384xf32>
    tpu.vector_store %arg8[%c16, %c0_7], %7 {strides = array<i32>} : memref<160x384xf32, #tpu.memory_space<vmem>>, vector<8x384xf32>,
    %c1_i32 = arith.constant 1 : i32
    %9 = tpu.dynamic_rotate %2 by %c1_i32 dim 1 : vector<8x384xf32>, i32 -> vector<8x384xf32>
    %c24 = arith.constant 24 : index
    %c0_8 = arith.constant 0 : index
    %10 = vector.load %arg8[%c24, %c0_8] : memref<160x384xf32, #tpu.memory_space<vmem>>, vector<8x384xf32>
    tpu.vector_store %arg8[%c24, %c0_8], %9 {strides = array<i32>} : memref<160x384xf32, #tpu.memory_space<vmem>>, vector<8x384xf32>,
    %c32 = arith.constant 32 : index
    %c0_9 = arith.constant 0 : index
    %11 = vector.load %arg8[%c32, %c0_9] : memref<160x384xf32, #tpu.memory_space<vmem>>, vector<8x384xf32>
    tpu.vector_store %arg8[%c32, %c0_9], %2 {strides = array<i32>} : memref<160x384xf32, #tpu.memory_space<vmem>>, vector<8x384xf32>,
    %c383_i32 = arith.constant 383 : i32
    %12 = tpu.dynamic_rotate %2 by %c383_i32 dim 1 : vector<8x384xf32>, i32 -> vector<8x384xf32>
    %c40 = arith.constant 40 : index
    %c0_10 = arith.constant 0 : index
    %13 = vector.load %arg8[%c40, %c0_10] : memref<160x384xf32, #tpu.memory_space<vmem>>, vector<8x384xf32>
    tpu.vector_store %arg8[%c40, %c0_10], %12 {strides = array<i32>} : memref<160x384xf32, #tpu.memory_space<vmem>>, vector<8x384xf32>,
    %c367_i32 = arith.constant 367 : i32
    %14 = tpu.dynamic_rotate %2 by %c367_i32 dim 1 : vector<8x384xf32>, i32 -> vector<8x384xf32>
    %c48 = arith.constant 48 : index
    %c0_11 = arith.constant 0 : index
    %15 = vector.load %arg8[%c48, %c0_11] : memref<160x384xf32, #tpu.memory_space<vmem>>, vector<8x384xf32>
    tpu.vector_store %arg8[%c48, %c0_11], %14 {strides = array<i32>} : memref<160x384xf32, #tpu.memory_space<vmem>>, vector<8x384xf32>,
    %c366_i32 = arith.constant 366 : i32
    %16 = tpu.dynamic_rotate %2 by %c366_i32 dim 1 : vector<8x384xf32>, i32 -> vector<8x384xf32>
    %c56 = arith.constant 56 : index
    %c0_12 = arith.constant 0 : index
    %17 = vector.load %arg8[%c56, %c0_12] : memref<160x384xf32, #tpu.memory_space<vmem>>, vector<8x384xf32>
    tpu.vector_store %arg8[%c56, %c0_12], %16 {strides = array<i32>} : memref<160x384xf32, #tpu.memory_space<vmem>>, vector<8x384xf32>,
    %c365_i32 = arith.constant 365 : i32
    %18 = tpu.dynamic_rotate %2 by %c365_i32 dim 1 : vector<8x384xf32>, i32 -> vector<8x384xf32>
    %c64 = arith.constant 64 : index
    %c0_13 = arith.constant 0 : index
    %19 = vector.load %arg8[%c64, %c0_13] : memref<160x384xf32, #tpu.memory_space<vmem>>, vector<8x384xf32>
    tpu.vector_store %arg8[%c64, %c0_13], %18 {strides = array<i32>} : memref<160x384xf32, #tpu.memory_space<vmem>>, vector<8x384xf32>,
    %20 = tpu.iota {dimensions = array<i32: 0>} : vector<8x384xi32>
    %c0_i32 = arith.constant 0 : i32
    %21 = vector.broadcast %c0_i32 : i32 to vector<8x384xi32>
    %22 = arith.cmpi eq, %20, %21 : vector<8x384xi32>
    %23 = arith.extui %22 : vector<8x384xi1> to vector<8x384xi32>
    %24 = arith.sitofp %23 : vector<8x384xi32> to vector<8x384xf32>
    %c72 = arith.constant 72 : index
    %c0_14 = arith.constant 0 : index
    %25 = vector.load %arg8[%c72, %c0_14] : memref<160x384xf32, #tpu.memory_space<vmem>>, vector<8x384xf32>
    tpu.vector_store %arg8[%c72, %c0_14], %24 {strides = array<i32>} : memref<160x384xf32, #tpu.memory_space<vmem>>, vector<8x384xf32>,
    %c0_15 = arith.constant 0 : index
    %c0_16 = arith.constant 0 : index
    %26 = vector.load %arg8[%c0_15, %c0_16] : memref<160x384xf32, #tpu.memory_space<vmem>>, vector<80x384xf32>
    %27 = arith.truncf %26 : vector<80x384xf32> to vector<80x384xbf16>
    %c0_17 = arith.constant 0 : index
    %c0_18 = arith.constant 0 : index
    %28 = vector.load %arg2[%c0_17, %c0_18] : memref<8x80xbf16, #tpu.memory_space<vmem>>, vector<8x80xbf16>
    %cst = arith.constant dense<0.000000e+00> : vector<8x384xf32>
    %29 = tpu.matmul %28, %27, %cst {dimension_numbers = #tpu.dot_dimension_numbers<[1], [0], [0], [1], [0, 0, 1, 1], [], []>} : vector<8x80xbf16>, vector<80x384xbf16>, vector<8x384xf32> -> vector<8x384xf32>
    %cst_19 = arith.constant 0.000000e+00 : f32
    %30 = vector.broadcast %cst_19 : f32 to vector<8x384xf32>
    %31 = arith.maximumf %29, %30 : vector<8x384xf32>
    %32 = vector.broadcast %0 : vector<1x384xf32> to vector<8x384xf32>
    %33 = arith.mulf %31, %32 : vector<8x384xf32>
    %c19_i32_20 = arith.constant 19 : i32
    %34 = tpu.dynamic_rotate %33 by %c19_i32_20 dim 1 : vector<8x384xf32>, i32 -> vector<8x384xf32>
    %c0_21 = arith.constant 0 : index
    %c0_22 = arith.constant 0 : index
    %35 = vector.load %arg8[%c0_21, %c0_22] : memref<160x384xf32, #tpu.memory_space<vmem>>, vector<8x384xf32>
    tpu.vector_store %arg8[%c0_21, %c0_22], %34 {strides = array<i32>} : memref<160x384xf32, #tpu.memory_space<vmem>>, vector<8x384xf32>,
    %c18_i32_23 = arith.constant 18 : i32
    %36 = tpu.dynamic_rotate %33 by %c18_i32_23 dim 1 : vector<8x384xf32>, i32 -> vector<8x384xf32>
    %c8_24 = arith.constant 8 : index
    %c0_25 = arith.constant 0 : index
    %37 = vector.load %arg8[%c8_24, %c0_25] : memref<160x384xf32, #tpu.memory_space<vmem>>, vector<8x384xf32>
    tpu.vector_store %arg8[%c8_24, %c0_25], %36 {strides = array<i32>} : memref<160x384xf32, #tpu.memory_space<vmem>>, vector<8x384xf32>,
    %c17_i32_26 = arith.constant 17 : i32
    %38 = tpu.dynamic_rotate %33 by %c17_i32_26 dim 1 : vector<8x384xf32>, i32 -> vector<8x384xf32>
    %c16_27 = arith.constant 16 : index
    %c0_28 = arith.constant 0 : index
    %39 = vector.load %arg8[%c16_27, %c0_28] : memref<160x384xf32, #tpu.memory_space<vmem>>, vector<8x384xf32>
    tpu.vector_store %arg8[%c16_27, %c0_28], %38 {strides = array<i32>} : memref<160x384xf32, #tpu.memory_space<vmem>>, vector<8x384xf32>,
    %c1_i32_29 = arith.constant 1 : i32
    %40 = tpu.dynamic_rotate %33 by %c1_i32_29 dim 1 : vector<8x384xf32>, i32 -> vector<8x384xf32>
    %c24_30 = arith.constant 24 : index
    %c0_31 = arith.constant 0 : index
    %41 = vector.load %arg8[%c24_30, %c0_31] : memref<160x384xf32, #tpu.memory_space<vmem>>, vector<8x384xf32>
    tpu.vector_store %arg8[%c24_30, %c0_31], %40 {strides = array<i32>} : memref<160x384xf32, #tpu.memory_space<vmem>>, vector<8x384xf32>,
    %c32_32 = arith.constant 32 : index
    %c0_33 = arith.constant 0 : index
    %42 = vector.load %arg8[%c32_32, %c0_33] : memref<160x384xf32, #tpu.memory_space<vmem>>, vector<8x384xf32>
    tpu.vector_store %arg8[%c32_32, %c0_33], %33 {strides = array<i32>} : memref<160x384xf32, #tpu.memory_space<vmem>>, vector<8x384xf32>,
    %c383_i32_34 = arith.constant 383 : i32
    %43 = tpu.dynamic_rotate %33 by %c383_i32_34 dim 1 : vector<8x384xf32>, i32 -> vector<8x384xf32>
    %c40_35 = arith.constant 40 : index
    %c0_36 = arith.constant 0 : index
    %44 = vector.load %arg8[%c40_35, %c0_36] : memref<160x384xf32, #tpu.memory_space<vmem>>, vector<8x384xf32>
    tpu.vector_store %arg8[%c40_35, %c0_36], %43 {strides = array<i32>} : memref<160x384xf32, #tpu.memory_space<vmem>>, vector<8x384xf32>,
    %c367_i32_37 = arith.constant 367 : i32
    %45 = tpu.dynamic_rotate %33 by %c367_i32_37 dim 1 : vector<8x384xf32>, i32 -> vector<8x384xf32>
    %c48_38 = arith.constant 48 : index
    %c0_39 = arith.constant 0 : index
    %46 = vector.load %arg8[%c48_38, %c0_39] : memref<160x384xf32, #tpu.memory_space<vmem>>, vector<8x384xf32>
    tpu.vector_store %arg8[%c48_38, %c0_39], %45 {strides = array<i32>} : memref<160x384xf32, #tpu.memory_space<vmem>>, vector<8x384xf32>,
    %c366_i32_40 = arith.constant 366 : i32
    %47 = tpu.dynamic_rotate %33 by %c366_i32_40 dim 1 : vector<8x384xf32>, i32 -> vector<8x384xf32>
    %c56_41 = arith.constant 56 : index
    %c0_42 = arith.constant 0 : index
    %48 = vector.load %arg8[%c56_41, %c0_42] : memref<160x384xf32, #tpu.memory_space<vmem>>, vector<8x384xf32>
    tpu.vector_store %arg8[%c56_41, %c0_42], %47 {strides = array<i32>} : memref<160x384xf32, #tpu.memory_space<vmem>>, vector<8x384xf32>,
    %c365_i32_43 = arith.constant 365 : i32
    %49 = tpu.dynamic_rotate %33 by %c365_i32_43 dim 1 : vector<8x384xf32>, i32 -> vector<8x384xf32>
    %c64_44 = arith.constant 64 : index
    %c0_45 = arith.constant 0 : index
    %50 = vector.load %arg8[%c64_44, %c0_45] : memref<160x384xf32, #tpu.memory_space<vmem>>, vector<8x384xf32>
    tpu.vector_store %arg8[%c64_44, %c0_45], %49 {strides = array<i32>} : memref<160x384xf32, #tpu.memory_space<vmem>>, vector<8x384xf32>,
    %51 = tpu.iota {dimensions = array<i32: 0>} : vector<8x384xi32>
    %c0_i32_46 = arith.constant 0 : i32
    %52 = vector.broadcast %c0_i32_46 : i32 to vector<8x384xi32>
    %53 = arith.cmpi eq, %51, %52 : vector<8x384xi32>
    %54 = arith.extui %53 : vector<8x384xi1> to vector<8x384xi32>
    %55 = arith.sitofp %54 : vector<8x384xi32> to vector<8x384xf32>
    %c72_47 = arith.constant 72 : index
    %c0_48 = arith.constant 0 : index
    %56 = vector.load %arg8[%c72_47, %c0_48] : memref<160x384xf32, #tpu.memory_space<vmem>>, vector<8x384xf32>
    tpu.vector_store %arg8[%c72_47, %c0_48], %55 {strides = array<i32>} : memref<160x384xf32, #tpu.memory_space<vmem>>, vector<8x384xf32>,
    %c0_49 = arith.constant 0 : index
    %c0_50 = arith.constant 0 : index
    %57 = vector.load %arg8[%c0_49, %c0_50] : memref<160x384xf32, #tpu.memory_space<vmem>>, vector<80x384xf32>
    %58 = arith.truncf %57 : vector<80x384xf32> to vector<80x384xbf16>
    %c0_51 = arith.constant 0 : index
    %c0_52 = arith.constant 0 : index
    %59 = vector.load %arg3[%c0_51, %c0_52] : memref<16x80xbf16, #tpu.memory_space<vmem>>, vector<16x80xbf16>
    %cst_53 = arith.constant dense<0.000000e+00> : vector<16x384xf32>
    %60 = tpu.matmul %59, %58, %cst_53 {dimension_numbers = #tpu.dot_dimension_numbers<[1], [0], [0], [1], [0, 0, 1, 1], [], []>} : vector<16x80xbf16>, vector<80x384xbf16>, vector<16x384xf32> -> vector<16x384xf32>
    %cst_54 = arith.constant 0.000000e+00 : f32
    %61 = vector.broadcast %cst_54 : f32 to vector<16x384xf32>
    %62 = arith.maximumf %60, %61 : vector<16x384xf32>
    %63 = vector.broadcast %0 : vector<1x384xf32> to vector<16x384xf32>
    %64 = arith.mulf %62, %63 : vector<16x384xf32>
    %c19_i32_55 = arith.constant 19 : i32
    %65 = tpu.dynamic_rotate %64 by %c19_i32_55 dim 1 : vector<16x384xf32>, i32 -> vector<16x384xf32>
    %c0_56 = arith.constant 0 : index
    %c0_57 = arith.constant 0 : index
    %66 = vector.load %arg8[%c0_56, %c0_57] : memref<160x384xf32, #tpu.memory_space<vmem>>, vector<16x384xf32>
    tpu.vector_store %arg8[%c0_56, %c0_57], %65 {strides = array<i32>} : memref<160x384xf32, #tpu.memory_space<vmem>>, vector<16x384xf32>,
    %c18_i32_58 = arith.constant 18 : i32
    %67 = tpu.dynamic_rotate %64 by %c18_i32_58 dim 1 : vector<16x384xf32>, i32 -> vector<16x384xf32>
    %c16_59 = arith.constant 16 : index
    %c0_60 = arith.constant 0 : index
    %68 = vector.load %arg8[%c16_59, %c0_60] : memref<160x384xf32, #tpu.memory_space<vmem>>, vector<16x384xf32>
    tpu.vector_store %arg8[%c16_59, %c0_60], %67 {strides = array<i32>} : memref<160x384xf32, #tpu.memory_space<vmem>>, vector<16x384xf32>,
    %c17_i32_61 = arith.constant 17 : i32
    %69 = tpu.dynamic_rotate %64 by %c17_i32_61 dim 1 : vector<16x384xf32>, i32 -> vector<16x384xf32>
    %c32_62 = arith.constant 32 : index
    %c0_63 = arith.constant 0 : index
    %70 = vector.load %arg8[%c32_62, %c0_63] : memref<160x384xf32, #tpu.memory_space<vmem>>, vector<16x384xf32>
    tpu.vector_store %arg8[%c32_62, %c0_63], %69 {strides = array<i32>} : memref<160x384xf32, #tpu.memory_space<vmem>>, vector<16x384xf32>,
    %c1_i32_64 = arith.constant 1 : i32
    %71 = tpu.dynamic_rotate %64 by %c1_i32_64 dim 1 : vector<16x384xf32>, i32 -> vector<16x384xf32>
    %c48_65 = arith.constant 48 : index
    %c0_66 = arith.constant 0 : index
    %72 = vector.load %arg8[%c48_65, %c0_66] : memref<160x384xf32, #tpu.memory_space<vmem>>, vector<16x384xf32>
    tpu.vector_store %arg8[%c48_65, %c0_66], %71 {strides = array<i32>} : memref<160x384xf32, #tpu.memory_space<vmem>>, vector<16x384xf32>,
    %c64_67 = arith.constant 64 : index
    %c0_68 = arith.constant 0 : index
    %73 = vector.load %arg8[%c64_67, %c0_68] : memref<160x384xf32, #tpu.memory_space<vmem>>, vector<16x384xf32>
    tpu.vector_store %arg8[%c64_67, %c0_68], %64 {strides = array<i32>} : memref<160x384xf32, #tpu.memory_space<vmem>>, vector<16x384xf32>,
    %c383_i32_69 = arith.constant 383 : i32
    %74 = tpu.dynamic_rotate %64 by %c383_i32_69 dim 1 : vector<16x384xf32>, i32 -> vector<16x384xf32>
    %c80 = arith.constant 80 : index
    %c0_70 = arith.constant 0 : index
    %75 = vector.load %arg8[%c80, %c0_70] : memref<160x384xf32, #tpu.memory_space<vmem>>, vector<16x384xf32>
    tpu.vector_store %arg8[%c80, %c0_70], %74 {strides = array<i32>} : memref<160x384xf32, #tpu.memory_space<vmem>>, vector<16x384xf32>,
    %c367_i32_71 = arith.constant 367 : i32
    %76 = tpu.dynamic_rotate %64 by %c367_i32_71 dim 1 : vector<16x384xf32>, i32 -> vector<16x384xf32>
    %c96 = arith.constant 96 : index
    %c0_72 = arith.constant 0 : index
    %77 = vector.load %arg8[%c96, %c0_72] : memref<160x384xf32, #tpu.memory_space<vmem>>, vector<16x384xf32>
    tpu.vector_store %arg8[%c96, %c0_72], %76 {strides = array<i32>} : memref<160x384xf32, #tpu.memory_space<vmem>>, vector<16x384xf32>,
    %c366_i32_73 = arith.constant 366 : i32
    %78 = tpu.dynamic_rotate %64 by %c366_i32_73 dim 1 : vector<16x384xf32>, i32 -> vector<16x384xf32>
    %c112 = arith.constant 112 : index
    %c0_74 = arith.constant 0 : index
    %79 = vector.load %arg8[%c112, %c0_74] : memref<160x384xf32, #tpu.memory_space<vmem>>, vector<16x384xf32>
    tpu.vector_store %arg8[%c112, %c0_74], %78 {strides = array<i32>} : memref<160x384xf32, #tpu.memory_space<vmem>>, vector<16x384xf32>,
    %c365_i32_75 = arith.constant 365 : i32
    %80 = tpu.dynamic_rotate %64 by %c365_i32_75 dim 1 : vector<16x384xf32>, i32 -> vector<16x384xf32>
    %c128 = arith.constant 128 : index
    %c0_76 = arith.constant 0 : index
    %81 = vector.load %arg8[%c128, %c0_76] : memref<160x384xf32, #tpu.memory_space<vmem>>, vector<16x384xf32>
    tpu.vector_store %arg8[%c128, %c0_76], %80 {strides = array<i32>} : memref<160x384xf32, #tpu.memory_space<vmem>>, vector<16x384xf32>,
    %82 = tpu.iota {dimensions = array<i32: 0>} : vector<16x384xi32>
    %c0_i32_77 = arith.constant 0 : i32
    %83 = vector.broadcast %c0_i32_77 : i32 to vector<16x384xi32>
    %84 = arith.cmpi eq, %82, %83 : vector<16x384xi32>
    %85 = arith.extui %84 : vector<16x384xi1> to vector<16x384xi32>
    %86 = arith.sitofp %85 : vector<16x384xi32> to vector<16x384xf32>
    %c144 = arith.constant 144 : index
    %c0_78 = arith.constant 0 : index
    %87 = vector.load %arg8[%c144, %c0_78] : memref<160x384xf32, #tpu.memory_space<vmem>>, vector<16x384xf32>
    tpu.vector_store %arg8[%c144, %c0_78], %86 {strides = array<i32>} : memref<160x384xf32, #tpu.memory_space<vmem>>, vector<16x384xf32>,
    %c0_79 = arith.constant 0 : index
    %c0_80 = arith.constant 0 : index
    %88 = vector.load %arg8[%c0_79, %c0_80] : memref<160x384xf32, #tpu.memory_space<vmem>>, vector<160x384xf32>
    %89 = arith.truncf %88 : vector<160x384xf32> to vector<160x384xbf16>
    %c0_81 = arith.constant 0 : index
    %c0_82 = arith.constant 0 : index
    %90 = vector.load %arg4[%c0_81, %c0_82] : memref<8x160xbf16, #tpu.memory_space<vmem>>, vector<8x160xbf16>
    %cst_83 = arith.constant dense<0.000000e+00> : vector<8x384xf32>
    %91 = tpu.matmul %90, %89, %cst_83 {dimension_numbers = #tpu.dot_dimension_numbers<[1], [0], [0], [1], [0, 0, 1, 1], [], []>} : vector<8x160xbf16>, vector<160x384xbf16>, vector<8x384xf32> -> vector<8x384xf32>
    %cst_84 = arith.constant 0.000000e+00 : f32
    %92 = vector.broadcast %cst_84 : f32 to vector<8x384xf32>
    %93 = arith.maximumf %91, %92 : vector<8x384xf32>
    %94 = vector.broadcast %0 : vector<1x384xf32> to vector<8x384xf32>
    %95 = arith.mulf %93, %94 : vector<8x384xf32>
    %c19_i32_85 = arith.constant 19 : i32
    %96 = tpu.dynamic_rotate %95 by %c19_i32_85 dim 1 : vector<8x384xf32>, i32 -> vector<8x384xf32>
    %c0_86 = arith.constant 0 : index
    %c0_87 = arith.constant 0 : index
    %97 = vector.load %arg8[%c0_86, %c0_87] : memref<160x384xf32, #tpu.memory_space<vmem>>, vector<8x384xf32>
    tpu.vector_store %arg8[%c0_86, %c0_87], %96 {strides = array<i32>} : memref<160x384xf32, #tpu.memory_space<vmem>>, vector<8x384xf32>,
    %c18_i32_88 = arith.constant 18 : i32
    %98 = tpu.dynamic_rotate %95 by %c18_i32_88 dim 1 : vector<8x384xf32>, i32 -> vector<8x384xf32>
    %c8_89 = arith.constant 8 : index
    %c0_90 = arith.constant 0 : index
    %99 = vector.load %arg8[%c8_89, %c0_90] : memref<160x384xf32, #tpu.memory_space<vmem>>, vector<8x384xf32>
    tpu.vector_store %arg8[%c8_89, %c0_90], %98 {strides = array<i32>} : memref<160x384xf32, #tpu.memory_space<vmem>>, vector<8x384xf32>,
    %c17_i32_91 = arith.constant 17 : i32
    %100 = tpu.dynamic_rotate %95 by %c17_i32_91 dim 1 : vector<8x384xf32>, i32 -> vector<8x384xf32>
    %c16_92 = arith.constant 16 : index
    %c0_93 = arith.constant 0 : index
    %101 = vector.load %arg8[%c16_92, %c0_93] : memref<160x384xf32, #tpu.memory_space<vmem>>, vector<8x384xf32>
    tpu.vector_store %arg8[%c16_92, %c0_93], %100 {strides = array<i32>} : memref<160x384xf32, #tpu.memory_space<vmem>>, vector<8x384xf32>,
    %c1_i32_94 = arith.constant 1 : i32
    %102 = tpu.dynamic_rotate %95 by %c1_i32_94 dim 1 : vector<8x384xf32>, i32 -> vector<8x384xf32>
    %c24_95 = arith.constant 24 : index
    %c0_96 = arith.constant 0 : index
    %103 = vector.load %arg8[%c24_95, %c0_96] : memref<160x384xf32, #tpu.memory_space<vmem>>, vector<8x384xf32>
    tpu.vector_store %arg8[%c24_95, %c0_96], %102 {strides = array<i32>} : memref<160x384xf32, #tpu.memory_space<vmem>>, vector<8x384xf32>,
    %c32_97 = arith.constant 32 : index
    %c0_98 = arith.constant 0 : index
    %104 = vector.load %arg8[%c32_97, %c0_98] : memref<160x384xf32, #tpu.memory_space<vmem>>, vector<8x384xf32>
    tpu.vector_store %arg8[%c32_97, %c0_98], %95 {strides = array<i32>} : memref<160x384xf32, #tpu.memory_space<vmem>>, vector<8x384xf32>,
    %c383_i32_99 = arith.constant 383 : i32
    %105 = tpu.dynamic_rotate %95 by %c383_i32_99 dim 1 : vector<8x384xf32>, i32 -> vector<8x384xf32>
    %c40_100 = arith.constant 40 : index
    %c0_101 = arith.constant 0 : index
    %106 = vector.load %arg8[%c40_100, %c0_101] : memref<160x384xf32, #tpu.memory_space<vmem>>, vector<8x384xf32>
    tpu.vector_store %arg8[%c40_100, %c0_101], %105 {strides = array<i32>} : memref<160x384xf32, #tpu.memory_space<vmem>>, vector<8x384xf32>,
    %c367_i32_102 = arith.constant 367 : i32
    %107 = tpu.dynamic_rotate %95 by %c367_i32_102 dim 1 : vector<8x384xf32>, i32 -> vector<8x384xf32>
    %c48_103 = arith.constant 48 : index
    %c0_104 = arith.constant 0 : index
    %108 = vector.load %arg8[%c48_103, %c0_104] : memref<160x384xf32, #tpu.memory_space<vmem>>, vector<8x384xf32>
    tpu.vector_store %arg8[%c48_103, %c0_104], %107 {strides = array<i32>} : memref<160x384xf32, #tpu.memory_space<vmem>>, vector<8x384xf32>,
    %c366_i32_105 = arith.constant 366 : i32
    %109 = tpu.dynamic_rotate %95 by %c366_i32_105 dim 1 : vector<8x384xf32>, i32 -> vector<8x384xf32>
    %c56_106 = arith.constant 56 : index
    %c0_107 = arith.constant 0 : index
    %110 = vector.load %arg8[%c56_106, %c0_107] : memref<160x384xf32, #tpu.memory_space<vmem>>, vector<8x384xf32>
    tpu.vector_store %arg8[%c56_106, %c0_107], %109 {strides = array<i32>} : memref<160x384xf32, #tpu.memory_space<vmem>>, vector<8x384xf32>,
    %c365_i32_108 = arith.constant 365 : i32
    %111 = tpu.dynamic_rotate %95 by %c365_i32_108 dim 1 : vector<8x384xf32>, i32 -> vector<8x384xf32>
    %c64_109 = arith.constant 64 : index
    %c0_110 = arith.constant 0 : index
    %112 = vector.load %arg8[%c64_109, %c0_110] : memref<160x384xf32, #tpu.memory_space<vmem>>, vector<8x384xf32>
    tpu.vector_store %arg8[%c64_109, %c0_110], %111 {strides = array<i32>} : memref<160x384xf32, #tpu.memory_space<vmem>>, vector<8x384xf32>,
    %113 = tpu.iota {dimensions = array<i32: 0>} : vector<8x384xi32>
    %c0_i32_111 = arith.constant 0 : i32
    %114 = vector.broadcast %c0_i32_111 : i32 to vector<8x384xi32>
    %115 = arith.cmpi eq, %113, %114 : vector<8x384xi32>
    %116 = arith.extui %115 : vector<8x384xi1> to vector<8x384xi32>
    %117 = arith.sitofp %116 : vector<8x384xi32> to vector<8x384xf32>
    %c72_112 = arith.constant 72 : index
    %c0_113 = arith.constant 0 : index
    %118 = vector.load %arg8[%c72_112, %c0_113] : memref<160x384xf32, #tpu.memory_space<vmem>>, vector<8x384xf32>
    tpu.vector_store %arg8[%c72_112, %c0_113], %117 {strides = array<i32>} : memref<160x384xf32, #tpu.memory_space<vmem>>, vector<8x384xf32>,
    %c0_114 = arith.constant 0 : index
    %c0_115 = arith.constant 0 : index
    %119 = vector.load %arg8[%c0_114, %c0_115] : memref<160x384xf32, #tpu.memory_space<vmem>>, vector<80x384xf32>
    %120 = arith.truncf %119 : vector<80x384xf32> to vector<80x384xbf16>
    %c0_116 = arith.constant 0 : index
    %c0_117 = arith.constant 0 : index
    %121 = vector.load %arg5[%c0_116, %c0_117] : memref<8x80xbf16, #tpu.memory_space<vmem>>, vector<8x80xbf16>
    %cst_118 = arith.constant dense<0.000000e+00> : vector<8x384xf32>
    %122 = tpu.matmul %121, %120, %cst_118 {dimension_numbers = #tpu.dot_dimension_numbers<[1], [0], [0], [1], [0, 0, 1, 1], [], []>} : vector<8x80xbf16>, vector<80x384xbf16>, vector<8x384xf32> -> vector<8x384xf32>
    %123 = arith.negf %122 : vector<8x384xf32>
    %124 = math.exp %123 : vector<8x384xf32>
    %cst_119 = arith.constant 1.000000e+00 : f32
    %125 = vector.broadcast %cst_119 : f32 to vector<8x384xf32>
    %126 = arith.addf %125, %124 : vector<8x384xf32>
    %127 = arith.divf %125, %126 : vector<8x384xf32>
    %c0_120 = arith.constant 0 : index
    %c0_121 = arith.constant 0 : index
    %c0_122 = arith.constant 0 : index
    %128 = vector.load %arg7[%c0_120, %c0_121, %c0_122] : memref<1x8x384xf32, #tpu.memory_space<vmem>>, vector<1x8x384xf32>
    %129 = vector.shape_cast %128 : vector<1x8x384xf32> to vector<8x384xf32>
    %130 = vector.shape_cast %127 : vector<8x384xf32> to vector<1x8x384xf32>
    tpu.vector_store %arg7[%c0_120, %c0_121, %c0_122], %130 {strides = array<i32>} : memref<1x8x384xf32, #tpu.memory_space<vmem>>, vector<1x8x384xf32>,
    return
  }
  func.func @transform_0(%arg0: i32) -> (i32, i32, i32) {
    %c0_i32 = arith.constant 0 : i32
    %c0_i32_0 = arith.constant 0 : i32
    %c0_i32_1 = arith.constant 0 : i32
    return %arg0, %c0_i32, %c0_i32_0 : i32, i32, i32
  }
  func.func @transform_1(%arg0: i32) -> (i32, i32) {
    %c0_i32 = arith.constant 0 : i32
    %c0_i32_0 = arith.constant 0 : i32
    %c0_i32_1 = arith.constant 0 : i32
    return %c0_i32, %c0_i32_0 : i32, i32
  }
  func.func @transform_2(%arg0: i32) -> (i32, i32) {
    %c0_i32 = arith.constant 0 : i32
    %c0_i32_0 = arith.constant 0 : i32
    %c0_i32_1 = arith.constant 0 : i32
    return %c0_i32, %c0_i32_0 : i32, i32
  }
  func.func @transform_3(%arg0: i32) -> (i32, i32) {
    %c0_i32 = arith.constant 0 : i32
    %c0_i32_0 = arith.constant 0 : i32
    %c0_i32_1 = arith.constant 0 : i32
    return %c0_i32, %c0_i32_0 : i32, i32
  }
  func.func @transform_4(%arg0: i32) -> (i32, i32) {
    %c0_i32 = arith.constant 0 : i32
    %c0_i32_0 = arith.constant 0 : i32
    %c0_i32_1 = arith.constant 0 : i32
    return %c0_i32, %c0_i32_0 : i32, i32
  }
  func.func @transform_5(%arg0: i32) -> (i32, i32) {
    %c0_i32 = arith.constant 0 : i32
    %c0_i32_0 = arith.constant 0 : i32
    %c0_i32_1 = arith.constant 0 : i32
    return %c0_i32, %c0_i32_0 : i32, i32
  }
  func.func @transform_6(%arg0: i32) -> (i32, i32, i32) {
    %c0_i32 = arith.constant 0 : i32
    %c0_i32_0 = arith.constant 0 : i32
    %c0_i32_1 = arith.constant 0 : i32
    return %arg0, %c0_i32, %c0_i32_0 : i32, i32, i32
  }
}

</mosaic_0001>

<bundles_post_ra>
// kernel: decoder_forward_nchw.1
= control target key start
LH: loop header
LB: loop body
LE: loop exit
PB: predicated region body
PF: predicated region fallthrough
CT: control target
= control target key end

     0   :  { %s1937_s21 = smov 0   ;;  %s2513_s0 = inlined_call_operand.vmem [shape: f32[2,8,384], index: 0, kind: input, shape index: {}]   ;;  %s2514_s1 = inlined_call_operand.vmem [shape: bf16[8,80], index: 1, kind: input, shape index: {}]   ;;  %s2515_s2 = inlined_call_operand.vmem [shape: bf16[16,80], index: 2, kind: input, shape index: {}]   ;;  %s2516_s3 = inlined_call_operand.vmem [shape: bf16[8,160], index: 3, kind: input, shape index: {}]   ;;  %s2517_s4 = inlined_call_operand.vmem [shape: bf16[8,80], index: 4, kind: input, shape index: {}]   ;;  %s2518_s5 = inlined_call_operand.vmem [shape: f32[1,384], index: 5, kind: input, shape index: {}]   ;;  %s2519_s6 = inlined_call_operand.vmem [shape: f32[2,8,384], index: 6, kind: output, shape index: {}]  }
   0x1 LB: > { %s1484_s22 = sadd.s32 4294967295, %s1887_s21   ;;  %p1488_p0 = scmp.ge.s32.totalorder %s1887_s21, 1  ;;  %s1887_s21 = sphi %s1937_s21, %s16_s21  }
   0x2   : > { %p212_p1 = scmp.lt.s32.totalorder %s1887_s21, 3 }
   0x4   : > { %p213_p2 = pnand %p1488_p0, %p212_p1 }
   0x5   : > { %p242_p3 = scmp.lt.s32.totalorder (!%p213_p2), %s1484_s22, 1  ;;  %s1890_s27 = smov (!%p213_p2), 111  }
   0x6   : > { %216 = sbr.rel (%p213_p2) target bundleno = 1462 (0x5b6), region = 44  ;;  %s1891_s28 = smov (!%p213_p2), 109  }
   0x7   : > { %s1892_s29 = smov (!%p213_p2), 110   ;;  %s1893_s30 = smov (!%p213_p2), 127  }
   0x8   : > { %s1894_s7 = smov (!%p213_p2), 1   ;;  %s1895_s8 = smov (!%p213_p2), 17  }
   0x9   : > { %s1898_s9 = smov (!%p213_p2), 18   ;;  %s1899_s10 = smov (!%p213_p2), 19  }
   0xb   : > { %s2525_s22 = smov (!%p242_p3, %s1484_s22), 1  ;;  %v1889_v0 = vmov 0.0   ;;  %v1896_v6 = vmov 0   ;;  %vm1897_vm0 = vmmov 0   ;;  %v263_v7 = vlaneseq }
   0xc   : > { %1562 = vmatprep.subr.bf16.mxu1 %v1889_v0  ;;  %s1604_s23 = smul.u32 24, %s2525_s22  ;;  %456 = vmatprep.mubr.bf16.mxu0 %v1896_v6  ;;  %vm1900_vm3 = vmmov 1   ;;  %v1901_v20 = vmov 1.0   ;;  %vm420_vm12 = vcmask 654336   ;;  %vm1085_vm13 = vcmask 261120  }
   0xd   : > { %1572 = vmatprep.mubr.msk.bf16.mxu1 %vm1897_vm0, %v1889_v0  ;;  %v1991_v8 = vand.u32 127, %v263_v7  ;;  %v1993_v9 = vshrl.u32 %v263_v7, 7 }
   0xe   : > { %s246_s26 = scalar_lea.vmem %s2513_s0, %s1604_s23 }
   0xf   : > { %v1954_v1 = vld [vmem:[%s246_s26 + $0x8] sm:$0xff]  ;;  %v1956_v2 = vld [vmem:[%s246_s26 + $0x10] sm:$0xff]  ;;  %v1962_v4 = vld [vmem:[%s246_s26] sm:$0xff]  ;;  %vm359_vm1 = vcmp.lt.s32.totalorder %v1991_v8, 109  ;;  %vm368_vm2 = vcmp.eq.s32.totalorder %v1993_v9, 0  ;;  %vm346_vm5 = vcmp.lt.s32.totalorder %v1991_v8, 110  ;;  %s251_s26 = scalar_lea.vmem %s2519_s6, %s1604_s23 }
  0x10   : > { %v1631_v3 = vpack.i.bf16 %v1956_v2, %v1954_v1  ;;  %v1651_v5 = vpack.i.bf16 %v1954_v1, %v1962_v4  ;;  %vm2002_vm4 = vmpackc.low %vm368_vm2, %vm1900_vm3  ;;  %vm333_vm6 = vcmp.lt.s32.totalorder %v1991_v8, 111  ;;  %vm320_vm7 = vcmp.lt.s32.totalorder %v1991_v8, 127 }
  0x11   : > { %vm304_vm8 = vcmp.lt.s32.totalorder %v1991_v8, 1  ;;  %vm291_vm9 = vcmp.lt.s32.totalorder %v1991_v8, 17  ;;  %vm278_vm10 = vcmp.lt.s32.totalorder %v1991_v8, 18  ;;  %vm265_vm11 = vcmp.lt.s32.totalorder %v1991_v8, 19  ;;  %vm2369_vm14 = vmpackc.low %vm1900_vm3, %vm368_vm2 }
  0x12   : > { %1632 = vrot.lane.b32.xlu1 %v1631_v3, %s1890_s27  ;;  %1627 = vrot.lane.b32.xlu0 %v1631_v3, %s1891_s28 }
  0x16   : > { %1637 = vrot.lane.b32.xlu1 %v1631_v3, %s1892_s29  ;;  %353 = vrot.lane.b32.xlu0 %v1962_v4, %s1891_s28 }
  0x1a   : > { %340 = vrot.lane.b32.xlu1 %v1962_v4, %s1892_s29  ;;  %327 = vrot.lane.b32.xlu0 %v1962_v4, %s1890_s27 }
  0x1e   : > { %314 = vrot.lane.b32.xlu1 %v1962_v4, %s1893_s30  ;;  %1642 = vrot.lane.b32.xlu0 %v1631_v3, %s1893_s30 }
  0x22   : > { %1652 = vrot.lane.b32.xlu1 %v1651_v5, %s1894_s7  ;;  %1647 = vrot.lane.b32.xlu0 %v1651_v5, %s1895_s8 }
  0x26   : > { %302 = vrot.lane.b32.xlu1 %v1956_v2, %s1894_s7  ;;  %289 = vrot.lane.b32.xlu0 %v1956_v2, %s1895_s8 }
  0x2a   : > { %1662 = vrot.lane.b32.xlu1 %v1651_v5, %s1898_s9  ;;  %1657 = vrot.lane.b32.xlu0 %v1651_v5, %s1899_s10 }
  0x2e   : > { %276 = vrot.lane.b32.xlu1 %v1956_v2, %s1898_s9  ;;  %261 = vrot.lane.b32.xlu0 %v1956_v2, %s1899_s10 }
  0x84   : > { %v1633_v10 = vpop.permute.xlu1 %1632  ;;  %v1628_v11 = vpop.permute.xlu0 %1627 }
  0x85   : > { %v1630_v12 = vunpack.i.h.bf16 %v1628_v11  ;;  %v1629_v13 = vunpack.i.l.bf16 %v1628_v11  ;;  %v1635_v14 = vunpack.i.h.bf16 %v1633_v10  ;;  %v1634_v15 = vunpack.i.l.bf16 %v1633_v10 }
  0x87   : > { %v360_v16 = vsel %vm359_vm1, %v1629_v13, %v1630_v12  ;;  %v334_v28 = vsel %vm333_vm6, %v1634_v15, %v1635_v14 }
  0x88   : > { %v1638_v18 = vpop.permute.xlu1 %1637  ;;  %v354_v19 = vpop.permute.xlu0 %353  ;;  %v1509_v21 = vpack.c.bf16 %v1901_v20, %v360_v16 }
  0x89   : > { %v1640_v22 = vunpack.i.h.bf16 %v1638_v18  ;;  %v1639_v23 = vunpack.i.l.bf16 %v1638_v18  ;;  %v361_v24 = vsel %vm359_vm1, %v354_v19, %v1629_v13  ;;  %v362_v25 = vsel %vm359_vm1, %v1630_v12, %v354_v19 }
  0x8a   : > { %v1512_v26 = vpack.c.bf16 %v1901_v20, %v361_v24  ;;  %v1515_v27 = vpack.c.bf16 %v1901_v20, %v362_v25  ;;  %1510 = vmatprep.subr.msk.bf16.mxu0 %vm2002_vm4, %v1509_v21  ;;  %v419_v25 = vld [vmem:[%s2514_s1] sm:$0xf] }
  0x8b   : > { %v347_v29 = vsel %vm346_vm5, %v1639_v23, %v1640_v22 }
  0x8c   : > { %v341_v30 = vpop.permute.xlu1 %340  ;;  %1513 = vmatpush1.bf16.msk.msra.mxu0 %vm2002_vm4, %v1512_v26  ;;  %1563 = vmatpush3.bf16.msk.msra.mxu1 %vm2002_vm4, %v1515_v27  ;;  %v328_v31 = vpop.permute.xlu0 %327  ;;  %v414_v32 = vpack.c.bf16 %v347_v29, %v334_v28  ;;  %v511_v26 = vsub.s32 0, %v1993_v9  ;;  %v519_v27 = vsub.s32 2, %v1993_v9  ;;  %v253_v28 = vld [vmem:[%s2518_s5] sm:$0x7] }
  0x8d   : > { %v348_v33 = vsel %vm346_vm5, %v341_v30, %v1639_v23  ;;  %v349_v34 = vsel %vm346_vm5, %v1640_v22, %v341_v30  ;;  %v335_v35 = vsel %vm333_vm6, %v328_v31, %v1634_v15  ;;  %v336_v36 = vsel %vm333_vm6, %v1635_v14, %v328_v31  ;;  %1564 = vmatprep.subr.bf16.mxu1 %v1889_v0 }
  0x8e   : > { %v413_v37 = vpack.c.bf16 %v348_v33, %v335_v35  ;;  %v415_v38 = vpack.c.bf16 %v349_v34, %v336_v36  ;;  %432 = vmatprep.subr.bf16.mxu0 %v414_v32  ;;  %v2089_v29 = vrot.slane %v253_v28, %v511_v26  ;;  %v2091_v30 = vrot.slane %v253_v28, %v519_v27 }
  0x8f   : > { %v515_v31 = vsub.s32 1, %v1993_v9 }
  0x90   : > { %v315_v39 = vpop.permute.xlu1 %314  ;;  %433 = vmatpush1.bf16.msra.mxu0 %v413_v37  ;;  %1565 = vmatpush3.bf16.msra.mxu1 %v415_v38  ;;  %v1643_v40 = vpop.permute.xlu0 %1642 }
  0x91   : > { %v1645_v41 = vunpack.i.h.bf16 %v1643_v40  ;;  %v1644_v42 = vunpack.i.l.bf16 %v1643_v40  ;;  %1566 = vmatprep.subr.bf16.mxu1 %v1889_v0 }
  0x93   : > { %v321_v43 = vsel %vm320_vm7, %v1644_v42, %v1645_v41  ;;  %v323_v44 = vsel %vm320_vm7, %v1645_v41, %v315_v39  ;;  %v322_v45 = vsel %vm320_vm7, %v315_v39, %v1644_v42  ;;  %v2100_v41 = vrot.slane %v253_v28, %v515_v31 }
  0x94   : > { %v1653_v46 = vpop.permute.xlu1 %1652  ;;  %v1648_v47 = vpop.permute.xlu0 %1647  ;;  %v411_v48 = vpack.c.bf16 %v321_v43, %v1954_v1  ;;  %v412_v49 = vpack.c.bf16 %v323_v44, %v1956_v2  ;;  %v410_v50 = vpack.c.bf16 %v322_v45, %v1962_v4 }
  0x95   : > { %v1655_v51 = vunpack.i.h.bf16 %v1653_v46  ;;  %v1654_v52 = vunpack.i.l.bf16 %v1653_v46  ;;  %v1650_v53 = vunpack.i.h.bf16 %v1648_v47  ;;  %v1649_v54 = vunpack.i.l.bf16 %v1648_v47 }
  0x96   : > { %434 = vmatprep.subr.bf16.mxu0 %v411_v48  ;;  %1567 = vmatpush3.bf16.msra.mxu1 %v412_v49 }
  0x97   : > { %435 = vmatpush1.bf16.msra.mxu0 %v410_v50  ;;  %v293_v55 = vsel %vm291_vm9, %v1649_v54, %v1650_v53  ;;  %v306_v56 = vsel %vm304_vm8, %v1654_v52, %v1655_v51  ;;  %1568 = vmatprep.subr.bf16.mxu1 %v1889_v0 }
  0x98   : > { %v303_v57 = vpop.permute.xlu1 %302  ;;  %v290_v58 = vpop.permute.xlu0 %289  ;;  %v408_v59 = vpack.c.bf16 %v306_v56, %v293_v55 }
  0x99   : > { %v305_v60 = vsel %vm304_vm8, %v1655_v51, %v303_v57  ;;  %v307_v61 = vsel %vm304_vm8, %v303_v57, %v1654_v52  ;;  %v292_v62 = vsel %vm291_vm9, %v1650_v53, %v290_v58  ;;  %v294_v63 = vsel %vm291_vm9, %v290_v58, %v1649_v54 }
  0x9a   : > { %v407_v1 = vpack.c.bf16 %v307_v61, %v294_v63  ;;  %v409_v2 = vpack.c.bf16 %v305_v60, %v292_v62  ;;  %436 = vmatprep.subr.bf16.mxu0 %v408_v59 }
  0x9c   : > { %v1663_v3 = vpop.permute.xlu1 %1662  ;;  %v1658_v4 = vpop.permute.xlu0 %1657  ;;  %437 = vmatpush1.bf16.msra.mxu0 %v407_v1  ;;  %1569 = vmatpush3.bf16.msra.mxu1 %v409_v2 }
  0x9d   : > { %v1665_v5 = vunpack.i.h.bf16 %v1663_v3  ;;  %v1664_v7 = vunpack.i.l.bf16 %v1663_v3  ;;  %v1660_v10 = vunpack.i.h.bf16 %v1658_v4  ;;  %v1659_v11 = vunpack.i.l.bf16 %v1658_v4  ;;  %1570 = vmatprep.subr.bf16.mxu1 %v1889_v0 }
  0x9f   : > { %v267_v12 = vsel %vm265_vm11, %v1659_v11, %v1660_v10  ;;  %v280_v13 = vsel %vm278_vm10, %v1664_v7, %v1665_v5 }
  0xa0   : > { %v277_v14 = vpop.permute.xlu1 %276  ;;  %v262_v15 = vpop.permute.xlu0 %261  ;;  %v405_v16 = vpack.c.bf16 %v280_v13, %v267_v12 }
  0xa1   : > { %v279_v18 = vsel %vm278_vm10, %v1665_v5, %v277_v14  ;;  %v281_v19 = vsel %vm278_vm10, %v277_v14, %v1664_v7  ;;  %v266_v21 = vsel %vm265_vm11, %v1660_v10, %v262_v15  ;;  %v268_v22 = vsel %vm265_vm11, %v262_v15, %v1659_v11 }
  0xa2   : > { %v404_v23 = vpack.c.bf16 %v281_v19, %v268_v22  ;;  %v406_v24 = vpack.c.bf16 %v279_v18, %v266_v21  ;;  %438 = vmatprep.subr.bf16.mxu0 %v405_v16 }
  0xa4   : > { %439 = vmatpush1.bf16.msra.mxu0 %v404_v23  ;;  %1571 = vmatpush3.bf16.msra.mxu1 %v406_v24 }
  0xa5   : > { %1576 = vmatprep.subr.bf16.mxu1 %v1889_v0 }
  0xa7   : > { %1492 = vmatmul.mubr.msk.bf16.vlgmr.msra.gmra.mxu0 %vm420_vm12, %v419_v25  ;;  %1573 = vmatmul.mubr.msk.bf16.vlgmr.msra.gmra.mxu1 %vm420_vm12, %v419_v25 }
  0xa8   : > { %716 = vmatprep.mubr.bf16.mxu0 %v1896_v6  ;;  %1586 = vmatprep.mubr.msk.bf16.mxu1 %vm1897_vm0, %v1889_v0 }
 0x167   : > { %v458_v32 = vpop.f32.mrf.mxu0  ;;  %v499_v33 = vpop.f32.mrf.mxu1 }
 0x168   : > { %v505_v34 = vmax.f32 %v458_v32, 0.0  ;;  %v507_v35 = vmax.f32 %v499_v33, 0.0 }
 0x169   : > { %v460_v36 = vpop.f32.mrf.mxu0  ;;  %v1574_v37 = vpop.f32.mrf.mxu1 }
 0x16a   : > { %v2095_v38 = vmul.f32 %v2089_v29, %v505_v34  ;;  %v2098_v39 = vmul.f32 %v2091_v30, %v507_v35  ;;  %v506_v40 = vmax.f32 %v460_v36, 0.0 }
 0x16b   : > { %v462_v42 = vpop.f32.mrf.mxu0  ;;  %v502_v43 = vpop.f32.mrf.mxu1 }
 0x16c   : > { %555 = vrot.lane.b32.xlu0 %v2098_v39, %s1895_s8  ;;  %614 = vrot.lane.b32.xlu1 %v2095_v38, %s1891_s28  ;;  %v2107_v46 = vmul.f32 %v2100_v41, %v506_v40 }
 0x16d   : > { %v463_v44 = vpop.f32.mrf.mxu0  ;;  %v1575_v45 = vpop.f32.mrf.mxu1 }
 0x16e   : > { %v1666_v47 = vpack.i.bf16 %v2098_v39, %v2107_v46  ;;  %v1691_v48 = vpack.i.bf16 %v2107_v46, %v2095_v38 }
 0x170   : > { %590 = vrot.lane.b32.xlu0 %v2095_v38, %s1890_s27  ;;  %602 = vrot.lane.b32.xlu1 %v2095_v38, %s1892_s29 }
 0x174   : > { %578 = vrot.lane.b32.xlu1 %v2095_v38, %s1893_s30  ;;  %1667 = vrot.lane.b32.xlu0 %v1666_v47, %s1891_s28 }
 0x178   : > { %1677 = vrot.lane.b32.xlu1 %v1666_v47, %s1892_s29  ;;  %1672 = vrot.lane.b32.xlu0 %v1666_v47, %s1890_s27 }
 0x17c   : > { %567 = vrot.lane.b32.xlu1 %v2098_v39, %s1894_s7  ;;  %1682 = vrot.lane.b32.xlu0 %v1666_v47, %s1893_s30 }
 0x180   : > { %1692 = vrot.lane.b32.xlu1 %v1691_v48, %s1894_s7  ;;  %1687 = vrot.lane.b32.xlu0 %v1691_v48, %s1895_s8 }
 0x184   : > { %1702 = vrot.lane.b32.xlu1 %v1691_v48, %s1898_s9  ;;  %1697 = vrot.lane.b32.xlu0 %v1691_v48, %s1899_s10 }
 0x188   : > { %543 = vrot.lane.b32.xlu1 %v2098_v39, %s1898_s9  ;;  %531 = vrot.lane.b32.xlu0 %v2098_v39, %s1899_s10 }
 0x1de   : > { %v556_v49 = vpop.permute.xlu0 %555  ;;  %v615_v50 = vpop.permute.xlu1 %614 }
 0x1e2   : > { %v591_v51 = vpop.permute.xlu0 %590  ;;  %v603_v52 = vpop.permute.xlu1 %602 }
 0x1e6   : > { %v579_v53 = vpop.permute.xlu1 %578  ;;  %v1668_v54 = vpop.permute.xlu0 %1667 }
 0x1e7   : > { %v1670_v55 = vunpack.i.h.bf16 %v1668_v54  ;;  %v1669_v56 = vunpack.i.l.bf16 %v1668_v54 }
 0x1e9   : > { %v622_v57 = vsel %vm359_vm1, %v1670_v55, %v615_v50  ;;  %v620_v58 = vsel %vm359_vm1, %v1669_v56, %v1670_v55  ;;  %v621_v59 = vsel %vm359_vm1, %v615_v50, %v1669_v56 }
 0x1ea   : > { %v1524_v60 = vpack.c.bf16 %v1901_v20, %v622_v57  ;;  %v1518_v61 = vpack.c.bf16 %v1901_v20, %v620_v58  ;;  %v1521_v62 = vpack.c.bf16 %v1901_v20, %v621_v59  ;;  %v1678_v63 = vpop.permute.xlu1 %1677  ;;  %v1673_v1 = vpop.permute.xlu0 %1672 }
 0x1eb   : > { %v1680_v2 = vunpack.i.h.bf16 %v1678_v63  ;;  %v1679_v3 = vunpack.i.l.bf16 %v1678_v63  ;;  %v1675_v4 = vunpack.i.h.bf16 %v1673_v1  ;;  %v1674_v5 = vunpack.i.l.bf16 %v1673_v1 }
 0x1ec   : > { %1519 = vmatprep.subr.msk.bf16.mxu0 %vm2002_vm4, %v1518_v61  ;;  %1577 = vmatpush3.bf16.msk.msra.mxu1 %vm2002_vm4, %v1524_v60 }
 0x1ed   : > { %v610_v7 = vsel %vm346_vm5, %v1680_v2, %v603_v52  ;;  %v609_v10 = vsel %vm346_vm5, %v603_v52, %v1679_v3  ;;  %v598_v11 = vsel %vm333_vm6, %v1675_v4, %v591_v51  ;;  %v597_v12 = vsel %vm333_vm6, %v591_v51, %v1674_v5  ;;  %1522 = vmatpush1.bf16.msk.msra.mxu0 %vm2002_vm4, %v1521_v62 }
 0x1ee   : > { %v670_v13 = vpack.c.bf16 %v610_v7, %v598_v11  ;;  %v668_v14 = vpack.c.bf16 %v609_v10, %v597_v12  ;;  %v568_v15 = vpop.permute.xlu1 %567  ;;  %v1683_v16 = vpop.permute.xlu0 %1682  ;;  %1578 = vmatprep.subr.bf16.mxu1 %v1889_v0  ;;  %v596_v18 = vsel %vm333_vm6, %v1674_v5, %v1675_v4  ;;  %v608_v19 = vsel %vm346_vm5, %v1679_v3, %v1680_v2  ;;  %v1866_v2 = vld [vmem:[%s2515_s2] sm:$0xff]  }
 0x1ef   : > { %v1685_v21 = vunpack.i.h.bf16 %v1683_v16  ;;  %v1684_v22 = vunpack.i.l.bf16 %v1683_v16  ;;  %v669_v23 = vpack.c.bf16 %v608_v19, %v596_v18 }
 0x1f0   : > { %1579 = vmatpush3.bf16.msra.mxu1 %v670_v13 }
 0x1f1   : > { %v586_v24 = vsel %vm320_vm7, %v1685_v21, %v579_v53  ;;  %v585_v25 = vsel %vm320_vm7, %v579_v53, %v1684_v22  ;;  %692 = vmatprep.subr.bf16.mxu0 %v669_v23  ;;  %1580 = vmatprep.subr.bf16.mxu1 %v1889_v0  ;;  %v584_v26 = vsel %vm320_vm7, %v1684_v22, %v1685_v21 }
 0x1f2   : > { %v667_v27 = vpack.c.bf16 %v586_v24, %v2098_v39  ;;  %v665_v28 = vpack.c.bf16 %v585_v25, %v2095_v38  ;;  %693 = vmatpush1.bf16.msra.mxu0 %v668_v14  ;;  %v1693_v31 = vpop.permute.xlu1 %1692  ;;  %v1688_v32 = vpop.permute.xlu0 %1687  ;;  %v666_v33 = vpack.c.bf16 %v584_v26, %v2107_v46 }
 0x1f3   : > { %v1695_v34 = vunpack.i.h.bf16 %v1693_v31  ;;  %v1694_v35 = vunpack.i.l.bf16 %v1693_v31  ;;  %v1690_v36 = vunpack.i.h.bf16 %v1688_v32  ;;  %v1689_v37 = vunpack.i.l.bf16 %v1688_v32 }
 0x1f4   : > { %694 = vmatprep.subr.bf16.mxu0 %v666_v33  ;;  %1581 = vmatpush3.bf16.msra.mxu1 %v667_v27 }
 0x1f5   : > { %v569_v40 = vsel %vm304_vm8, %v1695_v34, %v568_v15  ;;  %v571_v42 = vsel %vm304_vm8, %v568_v15, %v1694_v35  ;;  %v557_v38 = vsel %vm291_vm9, %v1690_v36, %v556_v49  ;;  %v559_v39 = vsel %vm291_vm9, %v556_v49, %v1689_v37  ;;  %1582 = vmatprep.subr.bf16.mxu1 %v1889_v0 }
 0x1f6   : > { %v664_v43 = vpack.c.bf16 %v569_v40, %v557_v38  ;;  %v662_v44 = vpack.c.bf16 %v571_v42, %v559_v39  ;;  %695 = vmatpush1.bf16.msra.mxu0 %v665_v28  ;;  %v1703_v45 = vpop.permute.xlu1 %1702  ;;  %v1698_v46 = vpop.permute.xlu0 %1697  ;;  %v558_v47 = vsel %vm291_vm9, %v1689_v37, %v1690_v36  ;;  %v570_v48 = vsel %vm304_vm8, %v1694_v35, %v1695_v34  ;;  %v2258_v36 = vld [vmem:[%s2516_s3] sm:$0xff] }
 0x1f7   : > { %v1705_v50 = vunpack.i.h.bf16 %v1703_v45  ;;  %v1704_v51 = vunpack.i.l.bf16 %v1703_v45  ;;  %v1700_v52 = vunpack.i.h.bf16 %v1698_v46  ;;  %v1699_v53 = vunpack.i.l.bf16 %v1698_v46 }
 0x1f8   : > { %v663_v54 = vpack.c.bf16 %v570_v48, %v558_v47  ;;  %1583 = vmatpush3.bf16.msra.mxu1 %v664_v43  ;;  %v1498_v37 = vcombine.high %v2258_v36, %v2258_v36 }
 0x1f9   : > { %v534_v49 = vsel %vm265_vm11, %v1699_v53, %v1700_v52  ;;  %v546_v55 = vsel %vm278_vm10, %v1704_v51, %v1705_v50  ;;  %1584 = vmatprep.subr.bf16.mxu1 %v1889_v0 }
 0x1fa   : > { %696 = vmatprep.subr.bf16.mxu0 %v663_v54  ;;  %v544_v56 = vpop.permute.xlu1 %543  ;;  %v532_v57 = vpop.permute.xlu0 %531  ;;  %v660_v58 = vpack.c.bf16 %v546_v55, %v534_v49 }
 0x1fb   : > { %697 = vmatpush1.bf16.msra.mxu0 %v662_v44  ;;  %v545_v59 = vsel %vm278_vm10, %v1705_v50, %v544_v56  ;;  %v547_v60 = vsel %vm278_vm10, %v544_v56, %v1704_v51  ;;  %v533_v61 = vsel %vm265_vm11, %v1700_v52, %v532_v57  ;;  %v535_v62 = vsel %vm265_vm11, %v532_v57, %v1699_v53 }
 0x1fc   : > { %v659_v63 = vpack.c.bf16 %v547_v60, %v535_v62  ;;  %v661_v1 = vpack.c.bf16 %v545_v59, %v533_v61  ;;  %698 = vmatprep.subr.bf16.mxu0 %v660_v58 }
 0x1fe   : > { %1585 = vmatpush3.bf16.msra.mxu1 %v661_v1 }
 0x1ff   : > { %699 = vmatpush1.bf16.msra.mxu0 %v659_v63  ;;  %1130 = vmatprep.subr.bf16.mxu1 %v1896_v6 }
 0x201   : > { %1587 = vmatmul.mubr.msk.bf16.vlgmr.msra.gmra.mxu1 %vm420_vm12, %v1866_v2 }
 0x202   : > { %1495 = vmatmul.mubr.msk.bf16.vlgmr.msra.gmra.mxu0 %vm420_vm12, %v1866_v2  ;;  %1500 = vmatprep.mubr.msk.bf16.mxu1 %vm1085_vm13, %v1498_v37 }
 0x203   : > { %1499 = vmatprep.mubr.msk.bf16.mxu0 %vm1085_vm13, %v1498_v37 }
 0x2c1   : > { %v761_v3 = vpop.f32.mrf.mxu1 }
 0x2c2   : > { %v718_v4 = vpop.f32.mrf.mxu0  ;;  %v770_v7 = vmax.f32 %v761_v3, 0.0 }
 0x2c3   : > { %v1588_v5 = vpop.f32.mrf.mxu1  ;;  %v768_v12 = vmax.f32 %v718_v4, 0.0 }
 0x2c4   : > { %v720_v10 = vpop.f32.mrf.mxu0  ;;  %v2204_v18 = vmul.f32 %v770_v7, %v2091_v30 }
 0x2c5   : > { %v764_v11 = vpop.f32.mrf.mxu1  ;;  %v2210_v23 = vmul.f32 %v768_v12, %v2089_v29  ;;  %v769_v26 = vmax.f32 %v720_v10, 0.0 }
 0x2c6   : > { %v722_v13 = vpop.f32.mrf.mxu0  ;;  %v773_v14 = vmax.f32 %v764_v11, 0.0 }
 0x2c7   : > { %v771_v15 = vmax.f32 %v722_v13, 0.0  ;;  %v1589_v16 = vpop.f32.mrf.mxu1  ;;  %v2225_v31 = vmul.f32 %v769_v26, %v2100_v41 }
 0x2c8   : > { %v2207_v19 = vmul.f32 %v773_v14, %v2091_v30  ;;  %v724_v21 = vpop.f32.mrf.mxu0 }
 0x2c9   : > { %v772_v22 = vmax.f32 %v724_v21, 0.0  ;;  %v2213_v24 = vmul.f32 %v771_v15, %v2089_v29 }
 0x2ca   : > { %v1711_v25 = vpack.i.bf16 %v2207_v19, %v2204_v18  ;;  %v1062_v32 = vpack.c.bf16 %v2207_v19, %v2204_v18 }
 0x2cb   : > { %v2220_v27 = vmul.f32 %v772_v22, %v2100_v41  ;;  %v1721_v28 = vpack.i.bf16 %v2213_v24, %v2210_v23  ;;  %v1060_v34 = vpack.c.bf16 %v2213_v24, %v2210_v23 }
 0x2cc   : > { %1712 = vrot.lane.b32.xlu0 %v1711_v25, %s1890_s27  ;;  %1707 = vrot.lane.b32.xlu1 %v1711_v25, %s1892_s29 }
 0x2cd   : > { %v1061_v33 = vpack.c.bf16 %v2220_v27, %v2225_v31  ;;  %v1731_v35 = vpack.i.bf16 %v2220_v27, %v2225_v31 }
 0x2d0   : > { %1717 = vrot.lane.b32.xlu1 %v1711_v25, %s1893_s30  ;;  %1722 = vrot.lane.b32.xlu0 %v1721_v28, %s1892_s29 }
 0x2d4   : > { %1727 = vrot.lane.b32.xlu1 %v1721_v28, %s1890_s27  ;;  %1732 = vrot.lane.b32.xlu0 %v1731_v35, %s1892_s29 }
 0x2d8   : > { %1742 = vrot.lane.b32.xlu1 %v1731_v35, %s1890_s27  ;;  %1737 = vrot.lane.b32.xlu0 %v1721_v28, %s1893_s30 }
 0x2dc   : > { %1747 = vrot.lane.b32.xlu1 %v1721_v28, %s1894_s7  ;;  %1757 = vrot.lane.b32.xlu0 %v1731_v35, %s1893_s30 }
 0x2e0   : > { %1752 = vrot.lane.b32.xlu1 %v1711_v25, %s1894_s7  ;;  %1762 = vrot.lane.b32.xlu0 %v1721_v28, %s1895_s8 }
 0x2e4   : > { %1777 = vrot.lane.b32.xlu1 %v1721_v28, %s1898_s9  ;;  %1767 = vrot.lane.b32.xlu0 %v1731_v35, %s1894_s7 }
 0x2e8   : > { %1782 = vrot.lane.b32.xlu1 %v1731_v35, %s1895_s8  ;;  %1772 = vrot.lane.b32.xlu0 %v1711_v25, %s1895_s8 }
 0x2ec   : > { %1787 = vrot.lane.b32.xlu1 %v1711_v25, %s1898_s9  ;;  %1792 = vrot.lane.b32.xlu0 %v1731_v35, %s1898_s9 }
 0x2f0   : > { %1802 = vrot.lane.b32.xlu1 %v1731_v35, %s1899_s10  ;;  %1797 = vrot.lane.b32.xlu0 %v1721_v28, %s1899_s10 }
 0x2f4   : > { %1817 = vrot.lane.b32.xlu1 %v1731_v35, %s1891_s28  ;;  %1807 = vrot.lane.b32.xlu0 %v1711_v25, %s1899_s10 }
 0x2f8   : > { %1822 = vrot.lane.b32.xlu1 %v1721_v28, %s1891_s28  ;;  %1812 = vrot.lane.b32.xlu0 %v1711_v25, %s1891_s28 }
 0x33e   : > { %v1713_v40 = vpop.permute.xlu0 %1712  ;;  %v1708_v42 = vpop.permute.xlu1 %1707 }
 0x33f   : > { %v1710_v43 = vunpack.i.h.bf16 %v1708_v42  ;;  %v1709_v44 = vunpack.i.l.bf16 %v1708_v42  ;;  %v1715_v50 = vunpack.i.h.bf16 %v1713_v40  ;;  %v1714_v51 = vunpack.i.l.bf16 %v1713_v40 }
 0x342   : > { %v1718_v38 = vpop.permute.xlu1 %1717  ;;  %v1723_v39 = vpop.permute.xlu0 %1722 }
 0x343   : > { %v1725_v45 = vunpack.i.h.bf16 %v1723_v39  ;;  %v1724_v46 = vunpack.i.l.bf16 %v1723_v39  ;;  %v1720_v58 = vunpack.i.h.bf16 %v1718_v38  ;;  %v1719_v59 = vunpack.i.l.bf16 %v1718_v38 }
 0x345   : > { %v947_v47 = vsel %vm346_vm5, %v1710_v43, %v1725_v45  ;;  %v946_v48 = vsel %vm346_vm5, %v1709_v44, %v1724_v46 }
 0x346   : > { %v1071_v52 = vpack.c.bf16 %v947_v47, %v946_v48  ;;  %v1728_v53 = vpop.permute.xlu1 %1727  ;;  %v1733_v54 = vpop.permute.xlu0 %1732 }
 0x347   : > { %v1730_v49 = vunpack.i.h.bf16 %v1728_v53  ;;  %v1729_v55 = vunpack.i.l.bf16 %v1728_v53  ;;  %v1735_v56 = vunpack.i.h.bf16 %v1733_v54  ;;  %v1734_v57 = vunpack.i.l.bf16 %v1733_v54 }
 0x348   : > { %1131 = vmatpush1.bf16.msra.mxu1 %v1071_v52 }
 0x349   : > { %v923_v60 = vsel %vm333_vm6, %v1715_v50, %v1730_v49  ;;  %v922_v61 = vsel %vm333_vm6, %v1714_v51, %v1729_v55  ;;  %v945_v62 = vsel %vm346_vm5, %v1725_v45, %v1735_v56  ;;  %v944_v63 = vsel %vm346_vm5, %v1724_v46, %v1734_v57  ;;  %1132 = vmatprep.subr.bf16.mxu1 %v1896_v6 }
 0x34a   : > { %v1068_v1 = vpack.c.bf16 %v923_v60, %v922_v61  ;;  %v1069_v2 = vpack.c.bf16 %v945_v62, %v944_v63  ;;  %v1743_v3 = vpop.permute.xlu1 %1742  ;;  %v1738_v4 = vpop.permute.xlu0 %1737  ;;  %v942_v5 = vsel %vm346_vm5, %v1734_v57, %v1709_v44  ;;  %v943_v7 = vsel %vm346_vm5, %v1735_v56, %v1710_v43 }
 0x34b   : > { %v1745_v10 = vunpack.i.h.bf16 %v1743_v3  ;;  %v1744_v11 = vunpack.i.l.bf16 %v1743_v3  ;;  %v1740_v12 = vunpack.i.h.bf16 %v1738_v4  ;;  %v1739_v13 = vunpack.i.l.bf16 %v1738_v4 }
 0x34c   : > { %v1070_v14 = vpack.c.bf16 %v943_v7, %v942_v5  ;;  %1133 = vmatpush1.bf16.msra.mxu1 %v1068_v1 }
 0x34d   : > { %v921_v15 = vsel %vm333_vm6, %v1730_v49, %v1745_v10  ;;  %v920_v16 = vsel %vm333_vm6, %v1729_v55, %v1744_v11  ;;  %v899_v21 = vsel %vm320_vm7, %v1720_v58, %v1740_v12  ;;  %v898_v22 = vsel %vm320_vm7, %v1719_v59, %v1739_v13  ;;  %1134 = vmatprep.subr.bf16.mxu1 %v1896_v6 }
 0x34e   : > { %v1065_v25 = vpack.c.bf16 %v899_v21, %v898_v22  ;;  %1089 = vmatprep.subr.bf16.mxu0 %v1070_v14  ;;  %v1748_v26 = vpop.permute.xlu1 %1747  ;;  %v1758_v28 = vpop.permute.xlu0 %1757  ;;  %v918_v35 = vsel %vm333_vm6, %v1744_v11, %v1714_v51  ;;  %v919_v37 = vsel %vm333_vm6, %v1745_v10, %v1715_v50  ;;  %v1066_v40 = vpack.c.bf16 %v921_v15, %v920_v16 }
 0x34f   : > { %1090 = vmatpush1.bf16.msra.mxu0 %v1069_v2  ;;  %v1760_v42 = vunpack.i.h.bf16 %v1758_v28  ;;  %v1759_v38 = vunpack.i.l.bf16 %v1758_v28  ;;  %v1067_v39 = vpack.c.bf16 %v919_v37, %v918_v35  ;;  %v1750_v54 = vunpack.i.h.bf16 %v1748_v26 }
 0x350   : > { %1135 = vmatpush1.bf16.msra.mxu1 %v1065_v25  ;;  %v1749_v49 = vunpack.i.l.bf16 %v1748_v26 }
 0x351   : > { %v896_v43 = vsel %vm320_vm7, %v1739_v13, %v1759_v38  ;;  %v897_v44 = vsel %vm320_vm7, %v1740_v12, %v1760_v42  ;;  %1136 = vmatprep.subr.bf16.mxu1 %v1896_v6  ;;  %v894_v45 = vsel %vm320_vm7, %v1759_v38, %v1719_v59  ;;  %v895_v46 = vsel %vm320_vm7, %v1760_v42, %v1720_v58 }
 0x352   : > { %1091 = vmatprep.subr.bf16.mxu0 %v1067_v39  ;;  %v1753_v47 = vpop.permute.xlu1 %1752  ;;  %v1763_v48 = vpop.permute.xlu0 %1762  ;;  %v1064_v50 = vpack.c.bf16 %v895_v46, %v894_v45  ;;  %v1063_v51 = vpack.c.bf16 %v897_v44, %v896_v43 }
 0x353   : > { %1092 = vmatpush1.bf16.msra.mxu0 %v1066_v40  ;;  %v1755_v52 = vunpack.i.h.bf16 %v1753_v47  ;;  %v1754_v53 = vunpack.i.l.bf16 %v1753_v47  ;;  %v1765_v62 = vunpack.i.h.bf16 %v1763_v48  ;;  %v1764_v63 = vunpack.i.l.bf16 %v1763_v48 }
 0x354   : > { %1093 = vmatprep.subr.bf16.mxu0 %v1064_v50  ;;  %1137 = vmatpush1.bf16.msra.mxu1 %v1062_v32 }
 0x355   : > { %1138 = vmatprep.subr.bf16.mxu1 %v1896_v6  ;;  %v868_v59 = vsel %vm304_vm8, %v1754_v53, %v1749_v49  ;;  %v869_v60 = vsel %vm304_vm8, %v1755_v52, %v1750_v54 }
 0x356   : > { %v1778_v55 = vpop.permute.xlu1 %1777  ;;  %v1768_v56 = vpop.permute.xlu0 %1767  ;;  %v1057_v7 = vpack.c.bf16 %v869_v60, %v868_v59 }
 0x357   : > { %1094 = vmatpush1.bf16.msra.mxu0 %v1063_v51  ;;  %v1770_v57 = vunpack.i.h.bf16 %v1768_v56  ;;  %v1769_v58 = vunpack.i.l.bf16 %v1768_v56  ;;  %v1780_v10 = vunpack.i.h.bf16 %v1778_v55  ;;  %v1779_v11 = vunpack.i.l.bf16 %v1778_v55 }
 0x358   : > { %1095 = vmatprep.subr.bf16.mxu0 %v1061_v33 }
 0x359   : > { %v865_v18 = vsel %vm304_vm8, %v1770_v57, %v1755_v52  ;;  %v864_v19 = vsel %vm304_vm8, %v1769_v58, %v1754_v53  ;;  %v866_v32 = vsel %vm304_vm8, %v1749_v49, %v1769_v58  ;;  %v867_v61 = vsel %vm304_vm8, %v1750_v54, %v1770_v57 }
 0x35a   : > { %v1059_v1 = vpack.c.bf16 %v865_v18, %v864_v19  ;;  %v1783_v2 = vpop.permute.xlu1 %1782  ;;  %v1773_v3 = vpop.permute.xlu0 %1772  ;;  %v1058_v4 = vpack.c.bf16 %v867_v61, %v866_v32  ;;  %v1527_v18 = vpack.c.bf16 %v1889_v0, %v1901_v20 }
 0x35b   : > { %1096 = vmatpush1.bf16.msra.mxu0 %v1060_v34  ;;  %v1785_v27 = vunpack.i.h.bf16 %v1783_v2  ;;  %v1784_v31 = vunpack.i.l.bf16 %v1783_v2  ;;  %v1775_v33 = vunpack.i.h.bf16 %v1773_v3  ;;  %v1774_v5 = vunpack.i.l.bf16 %v1773_v3 }
 0x35c   : > { %1097 = vmatprep.subr.bf16.mxu0 %v1058_v4  ;;  %1139 = vmatpush1.bf16.msra.mxu1 %v1059_v1 }
 0x35d   : > { %v841_v12 = vsel %vm291_vm9, %v1785_v27, %v1775_v33  ;;  %v840_v13 = vsel %vm291_vm9, %v1784_v31, %v1774_v5  ;;  %v844_v14 = vsel %vm291_vm9, %v1774_v5, %v1764_v63  ;;  %v845_v23 = vsel %vm291_vm9, %v1775_v33, %v1765_v62  ;;  %1140 = vmatprep.subr.bf16.mxu1 %v1896_v6 }
 0x35e   : > { %v1054_v24 = vpack.c.bf16 %v845_v23, %v844_v14  ;;  %v1056_v34 = vpack.c.bf16 %v841_v12, %v840_v13  ;;  %v1788_v15 = vpop.permute.xlu1 %1787  ;;  %v1793_v16 = vpop.permute.xlu0 %1792  ;;  %v842_v21 = vsel %vm291_vm9, %v1764_v63, %v1784_v31  ;;  %v843_v22 = vsel %vm291_vm9, %v1765_v62, %v1785_v27 }
 0x35f   : > { %1098 = vmatpush1.bf16.msra.mxu0 %v1057_v7  ;;  %v1790_v25 = vunpack.i.h.bf16 %v1788_v15  ;;  %v1789_v26 = vunpack.i.l.bf16 %v1788_v15  ;;  %v1795_v28 = vunpack.i.h.bf16 %v1793_v16  ;;  %v1794_v35 = vunpack.i.l.bf16 %v1793_v16 }
 0x360   : > { %v1055_v37 = vpack.c.bf16 %v843_v22, %v842_v21  ;;  %1141 = vmatpush1.bf16.msra.mxu1 %v1056_v34  ;;  %v1497_v16 = vcombine.low %v2258_v36, %v2258_v36 }
 0x361   : > { %v820_v40 = vsel %vm278_vm10, %v1789_v26, %v1779_v11  ;;  %v821_v42 = vsel %vm278_vm10, %v1790_v25, %v1780_v10  ;;  %v817_v38 = vsel %vm278_vm10, %v1795_v28, %v1790_v25  ;;  %v816_v39 = vsel %vm278_vm10, %v1794_v35, %v1789_v26  ;;  %1142 = vmatprep.subr.bf16.mxu1 %v1896_v6 }
 0x362   : > { %v1051_v43 = vpack.c.bf16 %v821_v42, %v820_v40  ;;  %v1053_v44 = vpack.c.bf16 %v817_v38, %v816_v39  ;;  %1099 = vmatprep.subr.bf16.mxu0 %v1055_v37  ;;  %v1803_v45 = vpop.permute.xlu1 %1802  ;;  %v1798_v46 = vpop.permute.xlu0 %1797  ;;  %v818_v47 = vsel %vm278_vm10, %v1779_v11, %v1794_v35  ;;  %v819_v48 = vsel %vm278_vm10, %v1780_v10, %v1795_v28 }
 0x363   : > { %1100 = vmatpush1.bf16.msra.mxu0 %v1054_v24  ;;  %v1805_v50 = vunpack.i.h.bf16 %v1803_v45  ;;  %v1804_v51 = vunpack.i.l.bf16 %v1803_v45  ;;  %v1800_v52 = vunpack.i.h.bf16 %v1798_v46  ;;  %v1799_v53 = vunpack.i.l.bf16 %v1798_v46 }
 0x364   : > { %v1052_v54 = vpack.c.bf16 %v819_v48, %v818_v47  ;;  %1143 = vmatpush1.bf16.msra.mxu1 %v1053_v44 }
 0x365   : > { %v794_v49 = vsel %vm265_vm11, %v1799_v53, %v1804_v51  ;;  %v795_v55 = vsel %vm265_vm11, %v1800_v52, %v1805_v50  ;;  %1144 = vmatprep.subr.bf16.mxu1 %v1896_v6 }
 0x366   : > { %1101 = vmatprep.subr.bf16.mxu0 %v1052_v54  ;;  %v1818_v56 = vpop.permute.xlu1 %1817  ;;  %v1808_v57 = vpop.permute.xlu0 %1807  ;;  %v1049_v58 = vpack.c.bf16 %v795_v55, %v794_v49 }
 0x367   : > { %1102 = vmatpush1.bf16.msra.mxu0 %v1051_v43  ;;  %v1810_v59 = vunpack.i.h.bf16 %v1808_v57  ;;  %v1809_v60 = vunpack.i.l.bf16 %v1808_v57  ;;  %v1820_v7 = vunpack.i.h.bf16 %v1818_v56  ;;  %v1819_v10 = vunpack.i.l.bf16 %v1818_v56 }
 0x368   : > { %1103 = vmatprep.subr.bf16.mxu0 %v1049_v58 }
 0x369   : > { %v793_v19 = vsel %vm265_vm11, %v1805_v50, %v1810_v59  ;;  %v792_v32 = vsel %vm265_vm11, %v1804_v51, %v1809_v60  ;;  %v796_v61 = vsel %vm265_vm11, %v1809_v60, %v1799_v53  ;;  %v797_v62 = vsel %vm265_vm11, %v1810_v59, %v1800_v52 }
 0x36a   : > { %v1048_v63 = vpack.c.bf16 %v797_v62, %v796_v61  ;;  %v1050_v1 = vpack.c.bf16 %v793_v19, %v792_v32  ;;  %v1823_v2 = vpop.permute.xlu1 %1822  ;;  %v1813_v3 = vpop.permute.xlu0 %1812 }
 0x36b   : > { %v1825_v27 = vunpack.i.h.bf16 %v1823_v2  ;;  %v1824_v31 = vunpack.i.l.bf16 %v1823_v2  ;;  %v1815_v33 = vunpack.i.h.bf16 %v1813_v3  ;;  %v1814_v5 = vunpack.i.l.bf16 %v1813_v3 }
 0x36c   : > { %1104 = vmatpush1.bf16.msra.mxu0 %v1048_v63  ;;  %1145 = vmatpush1.bf16.msra.mxu1 %v1050_v1 }
 0x36d   : > { %1528 = vmatprep.subr.msk.bf16.mxu0 %vm2369_vm14, %v1527_v18  ;;  %v968_v11 = vsel %vm359_vm1, %v1824_v31, %v1819_v10  ;;  %1158 = vmatprep.subr.bf16.mxu1 %v1896_v6  ;;  %v966_v9 = vsel %vm359_vm1, %v1819_v10, %v1814_v5  ;;  %v967_v12 = vsel %vm359_vm1, %v1820_v7, %v1815_v33 }
 0x36e   : > { %v969_v13 = vsel %vm359_vm1, %v1825_v27, %v1820_v7  ;;  %v971_v14 = vsel %vm359_vm1, %v1815_v33, %v1825_v27  ;;  %v970_v23 = vsel %vm359_vm1, %v1814_v5, %v1824_v31  ;;  %v1073_v24 = vpack.c.bf16 %v967_v12, %v966_v9 }
 0x36f   : > { %v1072_v34 = vpack.c.bf16 %v969_v13, %v968_v11  ;;  %v1074_v15 = vpack.c.bf16 %v971_v14, %v970_v23 }
 0x370   : > { %1531 = vmatpush2.bf16.msk.msra.mxu0 %vm2369_vm14, %v1527_v18  ;;  %1534 = vmatpush2.bf16.msk.msra.mxu1 %vm2369_vm14, %v1527_v18 }
 0x371   : > { %1119 = vmatprep.subr.bf16.mxu0 %v1073_v24  ;;  %1160 = vmatprep.subr.bf16.mxu1 %v1896_v6 }
 0x374   : > { %1120 = vmatpush2.bf16.msra.mxu0 %v1072_v34  ;;  %1161 = vmatpush2.bf16.msra.mxu1 %v1074_v15 }
 0x375   : > { %1590 = vmatprep.subr.bf16.mxu1 %v1889_v0 }
 0x377   : > { %1122 = vmatmul.mubr.bf16.vlgmr.msra.gmra.mxu0 %v1497_v16  ;;  %1163 = vmatmul.mubr.bf16.vlgmr.msra.gmra.mxu1 %v1497_v16 }
 0x378   : > { %1359 = vmatprep.mubr.bf16.mxu0 %v1896_v6  ;;  %1600 = vmatprep.mubr.msk.bf16.mxu1 %vm1897_vm0, %v1889_v0 }
 0x437   : > { %v1123_v21 = vpop.f32.mrf.mxu0  ;;  %v1164_v22 = vpop.f32.mrf.mxu1 }
 0x438   : > { %v1170_v25 = vmax.f32 %v1123_v21, 0.0  ;;  %v1172_v26 = vmax.f32 %v1164_v22, 0.0 }
 0x439   : > { %v1125_v28 = vpop.f32.mrf.mxu0  ;;  %v1166_v35 = vpop.f32.mrf.mxu1 }
 0x43a   : > { %v2400_v37 = vmul.f32 %v1170_v25, %v2089_v29  ;;  %v2403_v36 = vmul.f32 %v1172_v26, %v2091_v30  ;;  %v1171_v40 = vmax.f32 %v1125_v28, 0.0 }
 0x43b   : > { %v1127_v42 = vpop.f32.mrf.mxu0  ;;  %v1167_v38 = vpop.f32.mrf.mxu1 }
 0x43c   : > { %1204 = vrot.lane.b32.xlu0 %v2403_v36, %s1895_s8  ;;  %1263 = vrot.lane.b32.xlu1 %v2400_v37, %s1891_s28  ;;  %v2410_v43 = vmul.f32 %v1171_v40, %v2100_v41 }
 0x43d   : > { %v1128_v6 = vpop.f32.mrf.mxu0  ;;  %v1168_v39 = vpop.f32.mrf.mxu1 }
 0x43e   : > { %v1826_v29 = vpack.i.bf16 %v2403_v36, %v2410_v43  ;;  %v1851_v30 = vpack.i.bf16 %v2410_v43, %v2400_v37 }
 0x440   : > { %1239 = vrot.lane.b32.xlu0 %v2400_v37, %s1890_s27  ;;  %1251 = vrot.lane.b32.xlu1 %v2400_v37, %s1892_s29 }
 0x444   : > { %1227 = vrot.lane.b32.xlu1 %v2400_v37, %s1893_s30  ;;  %1827 = vrot.lane.b32.xlu0 %v1826_v29, %s1891_s28 }
 0x448   : > { %1837 = vrot.lane.b32.xlu1 %v1826_v29, %s1892_s29  ;;  %1832 = vrot.lane.b32.xlu0 %v1826_v29, %s1890_s27 }
 0x44c   : > { %1216 = vrot.lane.b32.xlu1 %v2403_v36, %s1894_s7  ;;  %1842 = vrot.lane.b32.xlu0 %v1826_v29, %s1893_s30 }
 0x450   : > { %1852 = vrot.lane.b32.xlu1 %v1851_v30, %s1894_s7  ;;  %1847 = vrot.lane.b32.xlu0 %v1851_v30, %s1895_s8 }
 0x454   : > { %1862 = vrot.lane.b32.xlu1 %v1851_v30, %s1898_s9  ;;  %1857 = vrot.lane.b32.xlu0 %v1851_v30, %s1899_s10 }
 0x458   : > { %1192 = vrot.lane.b32.xlu1 %v2403_v36, %s1898_s9  ;;  %1180 = vrot.lane.b32.xlu0 %v2403_v36, %s1899_s10 }
 0x4ae   : > { %v1205_v41 = vpop.permute.xlu0 %1204  ;;  %v1264_v44 = vpop.permute.xlu1 %1263 }
 0x4b2   : > { %v1240_v45 = vpop.permute.xlu0 %1239  ;;  %v1252_v46 = vpop.permute.xlu1 %1251 }
 0x4b6   : > { %v1228_v47 = vpop.permute.xlu1 %1227  ;;  %v1828_v48 = vpop.permute.xlu0 %1827 }
 0x4b7   : > { %v1830_v50 = vunpack.i.h.bf16 %v1828_v48  ;;  %v1829_v51 = vunpack.i.l.bf16 %v1828_v48 }
 0x4b9   : > { %v1271_v52 = vsel %vm359_vm1, %v1830_v50, %v1264_v44  ;;  %v1269_v53 = vsel %vm359_vm1, %v1829_v51, %v1830_v50  ;;  %v1270_v54 = vsel %vm359_vm1, %v1264_v44, %v1829_v51 }
 0x4ba   : > { %v1542_v49 = vpack.c.bf16 %v1901_v20, %v1271_v52  ;;  %v1536_v55 = vpack.c.bf16 %v1901_v20, %v1269_v53  ;;  %v1539_v56 = vpack.c.bf16 %v1901_v20, %v1270_v54  ;;  %v1838_v57 = vpop.permute.xlu1 %1837  ;;  %v1833_v58 = vpop.permute.xlu0 %1832 }
 0x4bb   : > { %v1840_v59 = vunpack.i.h.bf16 %v1838_v57  ;;  %v1839_v60 = vunpack.i.l.bf16 %v1838_v57  ;;  %v1835_v18 = vunpack.i.h.bf16 %v1833_v58  ;;  %v1834_v19 = vunpack.i.l.bf16 %v1833_v58 }
 0x4bc   : > { %1537 = vmatprep.subr.msk.bf16.mxu0 %vm2002_vm4, %v1536_v55  ;;  %1591 = vmatpush3.bf16.msk.msra.mxu1 %vm2002_vm4, %v1542_v49 }
 0x4bd   : > { %v1259_v32 = vsel %vm346_vm5, %v1840_v59, %v1252_v46  ;;  %v1258_v61 = vsel %vm346_vm5, %v1252_v46, %v1839_v60  ;;  %v1247_v20 = vsel %vm333_vm6, %v1835_v18, %v1240_v45  ;;  %v1246_v62 = vsel %vm333_vm6, %v1240_v45, %v1834_v19  ;;  %1540 = vmatpush1.bf16.msk.msra.mxu0 %vm2002_vm4, %v1539_v56 }
 0x4be   : > { %v1319_v63 = vpack.c.bf16 %v1259_v32, %v1247_v20  ;;  %v1317_v1 = vpack.c.bf16 %v1258_v61, %v1246_v62  ;;  %v1217_v2 = vpop.permute.xlu1 %1216  ;;  %v1843_v3 = vpop.permute.xlu0 %1842  ;;  %1592 = vmatprep.subr.bf16.mxu1 %v1889_v0  ;;  %v1245_v4 = vsel %vm333_vm6, %v1834_v19, %v1835_v18  ;;  %v1257_v27 = vsel %vm346_vm5, %v1839_v60, %v1840_v59 }
 0x4bf   : > { %v1845_v31 = vunpack.i.h.bf16 %v1843_v3  ;;  %v1844_v33 = vunpack.i.l.bf16 %v1843_v3  ;;  %v1318_v5 = vpack.c.bf16 %v1257_v27, %v1245_v4 }
 0x4c0   : > { %1593 = vmatpush3.bf16.msra.mxu1 %v1319_v63 }
 0x4c1   : > { %v1235_v17 = vsel %vm320_vm7, %v1845_v31, %v1228_v47  ;;  %v1234_v7 = vsel %vm320_vm7, %v1228_v47, %v1844_v33  ;;  %1335 = vmatprep.subr.bf16.mxu0 %v1318_v5  ;;  %1594 = vmatprep.subr.bf16.mxu1 %v1889_v0  ;;  %v1233_v10 = vsel %vm320_vm7, %v1844_v33, %v1845_v31 }
 0x4c2   : > { %v1316_v11 = vpack.c.bf16 %v1235_v17, %v2403_v36  ;;  %v1314_v9 = vpack.c.bf16 %v1234_v7, %v2400_v37  ;;  %1336 = vmatpush1.bf16.msra.mxu0 %v1317_v1  ;;  %v1853_v12 = vpop.permute.xlu1 %1852  ;;  %v1848_v13 = vpop.permute.xlu0 %1847  ;;  %v1315_v14 = vpack.c.bf16 %v1233_v10, %v2410_v43 }
 0x4c3   : > { %v1855_v23 = vunpack.i.h.bf16 %v1853_v12  ;;  %v1854_v24 = vunpack.i.l.bf16 %v1853_v12  ;;  %v1850_v34 = vunpack.i.h.bf16 %v1848_v13  ;;  %v1849_v15 = vunpack.i.l.bf16 %v1848_v13 }
 0x4c4   : > { %1337 = vmatprep.subr.bf16.mxu0 %v1315_v14  ;;  %1595 = vmatpush3.bf16.msra.mxu1 %v1316_v11 }
 0x4c5   : > { %v1218_v16 = vsel %vm304_vm8, %v1855_v23, %v1217_v2  ;;  %v1220_v21 = vsel %vm304_vm8, %v1217_v2, %v1854_v24  ;;  %v1206_v22 = vsel %vm291_vm9, %v1850_v34, %v1205_v41  ;;  %v1208_v25 = vsel %vm291_vm9, %v1205_v41, %v1849_v15  ;;  %1596 = vmatprep.subr.bf16.mxu1 %v1889_v0 }
 0x4c6   : > { %v1313_v26 = vpack.c.bf16 %v1218_v16, %v1206_v22  ;;  %v1311_v28 = vpack.c.bf16 %v1220_v21, %v1208_v25  ;;  %1338 = vmatpush1.bf16.msra.mxu0 %v1314_v9  ;;  %v1863_v35 = vpop.permute.xlu1 %1862  ;;  %v1858_v37 = vpop.permute.xlu0 %1857  ;;  %v1207_v36 = vsel %vm291_vm9, %v1849_v15, %v1850_v34  ;;  %v1219_v40 = vsel %vm304_vm8, %v1854_v24, %v1855_v23 }
 0x4c7   : > { %v1865_v42 = vunpack.i.h.bf16 %v1863_v35  ;;  %v1864_v38 = vunpack.i.l.bf16 %v1863_v35  ;;  %v1860_v6 = vunpack.i.h.bf16 %v1858_v37  ;;  %v1859_v39 = vunpack.i.l.bf16 %v1858_v37 }
 0x4c8   : > { %v1312_v43 = vpack.c.bf16 %v1219_v40, %v1207_v36  ;;  %1597 = vmatpush3.bf16.msra.mxu1 %v1313_v26 }
 0x4c9   : > { %v1183_v29 = vsel %vm265_vm11, %v1859_v39, %v1860_v6  ;;  %v1195_v30 = vsel %vm278_vm10, %v1864_v38, %v1865_v42  ;;  %1598 = vmatprep.subr.bf16.mxu1 %v1889_v0  ;;  %v1323_v0 = vld [vmem:[%s2517_s4] sm:$0xf] }
 0x4ca   : > { %1339 = vmatprep.subr.bf16.mxu0 %v1312_v43  ;;  %v1193_v41 = vpop.permute.xlu1 %1192  ;;  %v1181_v44 = vpop.permute.xlu0 %1180  ;;  %v1309_v45 = vpack.c.bf16 %v1195_v30, %v1183_v29 }
 0x4cb   : > { %1340 = vmatpush1.bf16.msra.mxu0 %v1311_v28  ;;  %v1194_v46 = vsel %vm278_vm10, %v1865_v42, %v1193_v41  ;;  %v1196_v47 = vsel %vm278_vm10, %v1193_v41, %v1864_v38  ;;  %v1182_v48 = vsel %vm265_vm11, %v1860_v6, %v1181_v44  ;;  %v1184_v50 = vsel %vm265_vm11, %v1181_v44, %v1859_v39 }
 0x4cc   : > { %v1308_v51 = vpack.c.bf16 %v1196_v47, %v1184_v50  ;;  %v1310_v52 = vpack.c.bf16 %v1194_v46, %v1182_v48  ;;  %1341 = vmatprep.subr.bf16.mxu0 %v1309_v45 }
 0x4ce   : > { %1599 = vmatpush3.bf16.msra.mxu1 %v1310_v52 }
 0x4cf   : > { %1342 = vmatpush1.bf16.msra.mxu0 %v1308_v51 }
 0x4d1   : > { %1601 = vmatmul.mubr.msk.bf16.vlgmr.msra.gmra.mxu1 %vm420_vm12, %v1323_v0 }
 0x4d2   : > { %1501 = vmatmul.mubr.msk.bf16.vlgmr.msra.gmra.mxu0 %vm420_vm12, %v1323_v0 }
 0x591   : > { %v1402_v53 = vpop.f32.mrf.mxu1 }
 0x592   : > { %v1361_v54 = vpop.f32.mrf.mxu0  ;;  %v1505_v49 = vmul.f32 -1.442695, %v1402_v53 }
 0x593   : > { %v1503_v55 = vmul.f32 -1.442695, %v1361_v54  ;;  %v1602_v56 = vpop.f32.mrf.mxu1 }
 0x594   : > { %1869 = vpow2.f32 %v1505_v49  ;;  %v1363_v8 = vpop.f32.mrf.mxu0 }
 0x595   : > { %1871 = vpow2.f32 %v1503_v55  ;;  %v1504_v57 = vmul.f32 -1.442695, %v1363_v8  ;;  %v1405_v58 = vpop.f32.mrf.mxu1 }
 0x596   : > { %v1365_v59 = vpop.f32.mrf.mxu0 }
 0x597   : > { %1873 = vpow2.f32 %v1504_v57  ;;  %v1603_v60 = vpop.f32.mrf.mxu1 }
 0x598   : > { %v1366_v18 = vpop.f32.mrf.mxu0 }
 0x5a1   : > { %v1870_v19 = vpop.eup %1869 }
 0x5a2   : > { %v1872_v32 = vpop.eup %1871  ;;  %v1419_v61 = vadd.f32 1.0, %v1870_v19 }
 0x5a3   : > { %v1417_v20 = vadd.f32 1.0, %v1872_v32 }
 0x5a4   : > { %v1874_v62 = vpop.eup %1873  ;;  %1875 = vrcp.f32 %v1419_v61 }
 0x5a5   : > { %1877 = vrcp.f32 %v1417_v20  ;;  %v1418_v63 = vadd.f32 1.0, %v1874_v62 }
 0x5a7   : > { %1879 = vrcp.f32 %v1418_v63 }
 0x5b1   : > { %v1876_v1 = vpop.eup %1875 }
 0x5b2   : > { %v1878_v2 = vpop.eup %1877  ;;  %1428 = vst [vmem:[%s251_s26 + $0x10] sm:$0xff] %v1876_v1 }
 0x5b3   : > { %1426 = vst [vmem:[%s251_s26] sm:$0xff] %v1878_v2 }
 0x5b4   : > { %v1880_v3 = vpop.eup %1879 }
 0x5b5   : > { %1427 = vst [vmem:[%s251_s26 + $0x8] sm:$0xff] %v1880_v3 }
 0x5b6 PF: > { %s16_s21 = sadd.s32 1, %s1887_s21  }
 0x5b7   : > { %p13_p4 = scmp.ge.s32.totalorder %s16_s21, 4  }
 0x5b9   :  { %15 = sbr.rel (!%p13_p4) target bundleno = 1 (0x1), region = 74 }

</bundles_post_ra>
